<compile_context>
chip_gen: v7x
topology: tpu7x:2x2x1
jax: 0.10.0
libtpu: 0.0.40
codegen_flags: <defaults>
</compile_context>

<pallas_src>
import jax
import jax.numpy as jnp
from jax import lax
from jax.experimental import pallas as pl
from jax.experimental.pallas import tpu as pltpu

BN_EPS = 1e-5
LANE = 128


# --------------------------------------------------------------------------- #
# trace-time helpers (pure Python on static shapes)
# --------------------------------------------------------------------------- #
def _round_up(x, m):
    return ((x + m - 1) // m) * m


def _pick_vmem_limit():
    """Per-generation scoped-VMEM budget (~96 MiB on v5e/v6e, ~48 MiB otherwise)."""
    try:
        cap = int(pltpu.get_tpu_info().vmem_capacity_bytes)
    except Exception:
        cap = 64 * 1024 * 1024          # conservative fallback: v7x physical VMEM
    return max(32 * 1024 * 1024, min(cap * 3 // 4, 96 * 1024 * 1024))


def _vmem_tile_bytes(shape, itemsize):
    """Conservative VMEM footprint of one tile incl. (sublane, lane) padding."""
    shape = tuple(int(d) for d in shape)
    if len(shape) == 1:
        shape = (1,) + shape
    sub_mult = 8 * max(1, 4 // itemsize)          # bf16 packs 2 rows / sublane
    lanes = _round_up(shape[-1], LANE)
    subs = _round_up(shape[-2], sub_mult)
    lead = 1
    for d in shape[:-2]:
        lead *= d
    return lead * subs * lanes * itemsize


def _divisors_desc(n):
    return sorted((d for d in range(1, n + 1) if n % d == 0), reverse=True)


def _largest_divisor_leq(n, cap, multiple_of=1):
    best = None
    d = 1
    while d * d <= n:
        if n % d == 0:
            for c in (d, n // d):
                if c <= cap and c % multiple_of == 0 and (best is None or c > best):
                    best = c
        d += 1
    return best


def _phase1_fits(HT, W, Cin, TCO, cbytes, budget):
    M = HT * W
    total = 0
    total += 2 * _vmem_tile_bytes((HT + 2, W + 2, Cin), cbytes)   # x halo tile (dbl buf)
    total += 2 * _vmem_tile_bytes((9 * Cin, TCO), cbytes)         # weight slab
    total += 2 * _vmem_tile_bytes((M, TCO), cbytes)               # conv out tile
    total += 2 * _vmem_tile_bytes((8, TCO), 4)                    # stats tile
    total += _vmem_tile_bytes((M, 9 * Cin), cbytes)               # im2col scratch
    total += 2 * _vmem_tile_bytes((M, TCO), 4)                    # f32 acc + temps
    return total <= budget


# --------------------------------------------------------------------------- #
# kernels
# --------------------------------------------------------------------------- #
def _conv_stats_kernel(x_ref, w_ref, conv_ref, stats_ref, patches_ref):
    """One (image n, H-halo-tile hb, Cout-tile j) grid step.

    x_ref      : (HT+2, W+2, Cin)   compute dtype (padded/halo'd NHWC tile)
    w_ref      : (9*Cin, TCO)       compute dtype, K ordered (kh, kw, cin)
    conv_ref   : (HT*W, TCO)        conv activations (bias dropped: cancels in BN)
    stats_ref  : (8, TCO)           f32 [sum, sum_sq, 0...] (8 rows -> unmasked store)
    patches_ref: (HT*W, 9*Cin)      VMEM scratch holding the fused-im2col tile
    """
    HT = x_ref.shape[0] - 2
    W = x_ref.shape[1] - 2
    cin = x_ref.shape[2]
    M = HT * W

    x = x_ref[...]                                    # stays in compute dtype (bf16 ok)

    # Fused im2col: 9 shifted windows packed into the (M, 9*Cin) scratch.
    for kh in range(3):
        for kw in range(3):
            t = kh * 3 + kw
            patches_ref[:, t * cin:(t + 1) * cin] = (
                x[kh:kh + HT, kw:kw + W, :].reshape(M, cin))

    # One MXU matmul, contraction depth 9*Cin, f32 accumulation.
    acc = jnp.dot(patches_ref[...], w_ref[...], preferred_element_type=jnp.float32)
    conv_ref[...] = acc.astype(conv_ref.dtype)

    # Single-pass BN partial statistics from the f32 accumulator.
    # TODO(synk): switch to a shifted/Welford combine if activations ever have a
    # large DC offset (sum-of-squares cancellation).
    s = jnp.sum(acc, axis=0, keepdims=True)           # (1, TCO)
    ss = jnp.sum(acc * acc, axis=0, keepdims=True)    # (1, TCO)
    stats_ref[...] = jnp.concatenate(
        [s, ss, jnp.zeros((6, s.shape[-1]), jnp.float32)], axis=0)


def _bn_relu_kernel(conv_ref, ab_ref, out_ref):
    """Normalize + ReLU one wide row tile.

    conv_ref: (TM, C2) ; ab_ref: (2, C2) f32 [scale; shift] ; out_ref: (TM, C2)
    """
    scale = ab_ref[0:1, :]
    shift = ab_ref[1:2, :]
    y = conv_ref[...].astype(jnp.float32) * scale + shift
    out_ref[...] = jnp.maximum(y, 0.0).astype(out_ref.dtype)


# --------------------------------------------------------------------------- #
# wrapper
# --------------------------------------------------------------------------- #
def conv_bn_forward(x_nchw, w_oihw, bias, gamma, beta, *,
                    compute_dtype=jnp.bfloat16, out_dtype=None):
    """relu(batchnorm(conv2d(x))) with k=3, stride=1, pad=1, training-mode BN.

    `bias` is accepted for API parity but unused: with batch statistics the BN
    mean subtraction cancels the conv bias exactly.
    compute_dtype (default bf16) is both the MXU input dtype and the dtype of
    the conv intermediate written to HBM; statistics/accumulation stay f32.
    """
    del bias
    N, Cin, H, W = (int(d) for d in x_nchw.shape)
    Cout = int(w_oihw.shape[0])
    assert w_oihw.shape[1:] == (Cin, 3, 3), "kernel supports k=3, stride=1, pad=1"
    if out_dtype is None:
        out_dtype = x_nchw.dtype

    vmem_limit = _pick_vmem_limit()
    budget = int(vmem_limit * 0.7)
    cbytes = jnp.dtype(compute_dtype).itemsize
    out_bytes = jnp.dtype(out_dtype).itemsize

    # Output-channel tiling: pad only when Cout exceeds one lane group.
    if Cout > LANE:
        Cout_pad = _round_up(Cout, LANE)
        TCO = LANE
    else:
        Cout_pad = Cout
        TCO = Cout
    n_co = Cout_pad // TCO

    # Spatial H tiling with a 2-row halo, sized to the per-generation VMEM budget.
    HT = None
    for cand in _divisors_desc(H):
        if _phase1_fits(cand, W, Cin, TCO, cbytes, budget):
            HT = cand
            break
    if HT is None:
        HT = 1
    nH = H // HT
    M = HT * W

    # ---- glue: pure layout, every element read once by the kernels ----
    x_nhwc = jnp.transpose(x_nchw, (0, 2, 3, 1)).astype(compute_dtype)
    x_pad = jnp.pad(x_nhwc, ((0, 0), (1, 1), (1, 1), (0, 0)))       # (N, H+2, W+2, Cin)
    if nH == 1:
        x_halo = x_pad[:, None]                                     # (N, 1, H+2, W+2, Cin)
    else:
        x_halo = jnp.stack(
            [x_pad[:, hb * HT: hb * HT + HT + 2] for hb in range(nH)], axis=1)
    w_k = jnp.transpose(w_oihw, (2, 3, 1, 0)).astype(compute_dtype).reshape(9 * Cin, Cout)
    if Cout_pad != Cout:
        w_k = jnp.pad(w_k, ((0, 0), (0, Cout_pad - Cout)))

    # ---- phase 1: fused im2col + single K=9*Cin MXU matmul + partial BN stats ----
    grid_spec = pltpu.PrefetchScalarGridSpec(
        num_scalar_prefetch=0,
        grid=(N, nH, n_co),
        in_specs=[
            pl.BlockSpec((None, None, HT + 2, W + 2, Cin),
                         lambda n, hb, j: (n, hb, 0, 0, 0)),
            pl.BlockSpec((9 * Cin, TCO), lambda n, hb, j: (0, j)),
        ],
        out_specs=(
            pl.BlockSpec((None, None, M, TCO), lambda n, hb, j: (n, hb, 0, j)),
            pl.BlockSpec((None, None, 8, TCO), lambda n, hb, j: (n, hb, 0, j)),
        ),
        scratch_shapes=[pltpu.VMEM((M, 9 * Cin), compute_dtype)],
    )
    conv_act, stats = pl.pallas_call(
        _conv_stats_kernel,
        out_shape=(
            jax.ShapeDtypeStruct((N, nH, M, Cout_pad), compute_dtype),
            jax.ShapeDtypeStruct((N, nH, 8, Cout_pad), jnp.float32),
        ),
        grid_spec=grid_spec,
        compiler_params=pltpu.CompilerParams(
            dimension_semantics=("parallel", "parallel", "parallel"),
            vmem_limit_bytes=vmem_limit),
    )(x_halo, w_k)

    # ---- tiny XLA combine: fold gamma / mean / inv_std into one (scale, shift) ----
    tot = jnp.sum(stats, axis=(0, 1))                    # (8, Cout_pad) f32
    inv_count = 1.0 / float(N * H * W)
    mean = tot[0] * inv_count
    var = jnp.maximum(tot[1] * inv_count - mean * mean, 0.0)
    inv_std = lax.rsqrt(var + BN_EPS)
    gamma_p = gamma.astype(jnp.float32)
    beta_p = beta.astype(jnp.float32)
    if Cout_pad != Cout:
        gamma_p = jnp.pad(gamma_p, (0, Cout_pad - Cout))
        beta_p = jnp.pad(beta_p, (0, Cout_pad - Cout))
    scale = gamma_p * inv_std
    shift = beta_p - mean * scale

    # ---- phase 2: fused scale/shift + ReLU over wide, lane-dense row tiles ----
    R = N * H * W
    conv_flat = conv_act.reshape(R, Cout_pad)
    R_pad = _round_up(R, 16)
    if R_pad != R:
        conv_flat = jnp.pad(conv_flat, ((0, R_pad - R), (0, 0)))

    def _phase2_plan(k_rep):
        r2 = R_pad // k_rep
        c2 = k_rep * Cout_pad
        per_row = _round_up(c2, LANE) * (2 * cbytes + 2 * out_bytes + 8)
        tm_cap = max(16, min(8192, (budget // per_row) // 16 * 16))
        tm = _largest_divisor_leq(r2, tm_cap, multiple_of=16)
        if tm is None and r2 * per_row <= budget:
            tm = r2                                       # full-dim block, fits budget
        return r2, c2, tm

    k_rep = 1
    if Cout_pad < LANE:                                   # fold rows into lanes
        want = max(1, 256 // Cout_pad)
        while k_rep * 2 <= want and R_pad % (k_rep * 2) == 0:
            k_rep *= 2
    R2, C2, TM = _phase2_plan(k_rep)
    if TM is None:                                        # degenerate factorisation
        k_rep = 1
        R2, C2, TM = _phase2_plan(1)
    assert TM is not None and R2 % TM == 0

    conv_wide = conv_flat.reshape(R2, C2)
    ab_wide = jnp.stack([jnp.tile(scale, k_rep), jnp.tile(shift, k_rep)], axis=0)

    out_wide = pl.pallas_call(
        _bn_relu_kernel,
        out_shape=jax.ShapeDtypeStruct((R2, C2), out_dtype),
        grid=(R2 // TM,),
        in_specs=[
            pl.BlockSpec((TM, C2), lambda i: (i, 0)),
            pl.BlockSpec((2, C2), lambda i: (0, 0)),
        ],
        out_specs=pl.BlockSpec((TM, C2), lambda i: (i, 0)),
        compiler_params=pltpu.CompilerParams(
            dimension_semantics=("parallel",),
            vmem_limit_bytes=vmem_limit),
    )(conv_wide, ab_wide)

    # back to NCHW, dropping row padding and any lane-padded channels
    out_nhwc = out_wide.reshape(R_pad, Cout_pad)[:R, :Cout].reshape(N, H, W, Cout)
    return jnp.transpose(out_nhwc, (0, 3, 1, 2))


# --------------------------------------------------------------------------- #
# pure-JAX reference (PyTorch Conv2d + BatchNorm2d(train) + ReLU)
# --------------------------------------------------------------------------- #
def reference_forward(x_nchw, w_oihw, bias, gamma, beta):
    conv = lax.conv_general_dilated(
        x_nchw.astype(jnp.float32), w_oihw.astype(jnp.float32),
        window_strides=(1, 1), padding=((1, 1), (1, 1)),
        dimension_numbers=("NCHW", "OIHW", "NCHW"))
    conv = conv + bias.reshape(1, -1, 1, 1)
    mean = jnp.mean(conv, axis=(0, 2, 3), keepdims=True)
    var = jnp.mean((conv - mean) ** 2, axis=(0, 2, 3), keepdims=True)
    y = (conv - mean) * lax.rsqrt(var + BN_EPS)
    y = y * gamma.reshape(1, -1, 1, 1) + beta.reshape(1, -1, 1, 1)
    return jnp.maximum(y, 0.0)


if __name__ == "__main__":
    # shapes consistent with the module: batch=2, in_planes=4, planes=8, spatial=16
    N, Cin, Cout, H, W = 2, 4, 8, 16, 16
    key = jax.random.PRNGKey(0)
    kx, kw, kb = jax.random.split(key, 3)

    x = jax.random.normal(kx, (N, Cin, H, W), dtype=jnp.float32)
    fan_in = Cin * 3 * 3
    bound = 1.0 / (fan_in ** 0.5)
    w = jax.random.uniform(kw, (Cout, Cin, 3, 3), minval=-bound, maxval=bound,
                           dtype=jnp.float32)
    b = jax.random.uniform(kb, (Cout,), minval=-bound, maxval=bound, dtype=jnp.float32)
    gamma = 1.0 + 0.1 * jnp.cos(jnp.arange(Cout, dtype=jnp.float32))
    beta = 0.1 * jnp.sin(jnp.arange(Cout, dtype=jnp.float32))

    # Full-f32 path: tight check vs the PyTorch-equivalent reference
    # (the dropped conv bias cancels exactly under batch-statistic BN).
    out_f32 = jax.block_until_ready(
        conv_bn_forward(x, w, b, gamma, beta, compute_dtype=jnp.float32))
    ref = reference_forward(x, w, b, gamma, beta)
    assert out_f32.shape == (N, Cout, H, W)
    assert jnp.allclose(out_f32, ref, atol=5e-4, rtol=5e-4), "f32 mismatch vs reference"

    # Default performance path (bf16 MXU feed + bf16 conv intermediate, f32 stats):
    # compare against a reference computed from bf16-quantized inputs in f32 math.
    out_bf = jax.block_until_ready(conv_bn_forward(x, w, b, gamma, beta))
    q = lambda a: a.astype(jnp.bfloat16).astype(jnp.float32)
    ref_bf = reference_forward(q(x), q(w), b, gamma, beta)
    assert out_bf.shape == (N, Cout, H, W)
    assert jnp.allclose(out_bf, ref_bf, atol=3e-2, rtol=3e-2), "bf16 mismatch vs reference"

    print("KERNEL_OK")
</pallas_src>

<mosaic_0001>
module attributes {stable_mosaic.version = 11 : i64} {
  func.func @_conv_stats_kernel(%arg0: i32, %arg1: i32, %arg2: i32, %arg3: memref<1x1x18x18x4xf32, #tpu.memory_space<vmem>>, %arg4: memref<36x8xf32, #tpu.memory_space<vmem>>, %arg5: memref<1x1x256x8xf32, #tpu.memory_space<vmem>>, %arg6: memref<1x1x8x8xf32, #tpu.memory_space<vmem>>, %arg7: memref<256x36xf32, #tpu.memory_space<vmem>>) attributes {dimension_semantics = [#tpu.dimension_semantics<parallel>, #tpu.dimension_semantics<parallel>, #tpu.dimension_semantics<parallel>], iteration_bounds = array<i64: 2, 1, 1>, scalar_prefetch = 0 : i64, scratch_operands = 1 : i64, tpu.core_type = #tpu.core_type<tc>, window_params = [{transform_indices = @transform_0, window_bounds = array<i64: 1, 1, 18, 18, 4>}, {transform_indices = @transform_1, window_bounds = array<i64: 36, 8>}, {transform_indices = @transform_2, window_bounds = array<i64: 1, 1, 256, 8>}, {transform_indices = @transform_3, window_bounds = array<i64: 1, 1, 8, 8>}]} {
    %c0 = arith.constant 0 : index
    %c0_0 = arith.constant 0 : index
    %c0_1 = arith.constant 0 : index
    %c0_2 = arith.constant 0 : index
    %c0_3 = arith.constant 0 : index
    %0 = vector.load %arg3[%c0, %c0_0, %c0_1, %c0_2, %c0_3] : memref<1x1x18x18x4xf32, #tpu.memory_space<vmem>>, vector<1x1x18x18x4xf32>
    %1 = vector.shape_cast %0 : vector<1x1x18x18x4xf32> to vector<18x18x4xf32>
    %2 = vector.extract_strided_slice %1 {offsets = [0, 0, 0], sizes = [16, 16, 4], strides = [1, 1, 1]} : vector<18x18x4xf32> to vector<16x16x4xf32>
    %3 = vector.shape_cast %2 : vector<16x16x4xf32> to vector<256x4xf32>
    %c0_4 = arith.constant 0 : index
    %c0_5 = arith.constant 0 : index
    %4 = vector.load %arg7[%c0_4, %c0_5] : memref<256x36xf32, #tpu.memory_space<vmem>>, vector<256x4xf32>
    tpu.vector_store %arg7[%c0_4, %c0_5], %3 {strides = array<i32>} : memref<256x36xf32, #tpu.memory_space<vmem>>, vector<256x4xf32>,
    %5 = vector.extract_strided_slice %1 {offsets = [0, 1, 0], sizes = [16, 16, 4], strides = [1, 1, 1]} : vector<18x18x4xf32> to vector<16x16x4xf32>
    %6 = vector.shape_cast %5 : vector<16x16x4xf32> to vector<256x4xf32>
    %c0_6 = arith.constant 0 : index
    %c4 = arith.constant 4 : index
    %7 = vector.load %arg7[%c0_6, %c4] : memref<256x36xf32, #tpu.memory_space<vmem>>, vector<256x4xf32>
    tpu.vector_store %arg7[%c0_6, %c4], %6 {strides = array<i32>} : memref<256x36xf32, #tpu.memory_space<vmem>>, vector<256x4xf32>,
    %8 = vector.extract_strided_slice %1 {offsets = [0, 2, 0], sizes = [16, 16, 4], strides = [1, 1, 1]} : vector<18x18x4xf32> to vector<16x16x4xf32>
    %9 = vector.shape_cast %8 : vector<16x16x4xf32> to vector<256x4xf32>
    %c0_7 = arith.constant 0 : index
    %c8 = arith.constant 8 : index
    %10 = vector.load %arg7[%c0_7, %c8] : memref<256x36xf32, #tpu.memory_space<vmem>>, vector<256x4xf32>
    tpu.vector_store %arg7[%c0_7, %c8], %9 {strides = array<i32>} : memref<256x36xf32, #tpu.memory_space<vmem>>, vector<256x4xf32>,
    %11 = vector.extract_strided_slice %1 {offsets = [1, 0, 0], sizes = [16, 16, 4], strides = [1, 1, 1]} : vector<18x18x4xf32> to vector<16x16x4xf32>
    %12 = vector.shape_cast %11 : vector<16x16x4xf32> to vector<256x4xf32>
    %c0_8 = arith.constant 0 : index
    %c12 = arith.constant 12 : index
    %13 = vector.load %arg7[%c0_8, %c12] : memref<256x36xf32, #tpu.memory_space<vmem>>, vector<256x4xf32>
    tpu.vector_store %arg7[%c0_8, %c12], %12 {strides = array<i32>} : memref<256x36xf32, #tpu.memory_space<vmem>>, vector<256x4xf32>,
    %14 = vector.extract_strided_slice %1 {offsets = [1, 1, 0], sizes = [16, 16, 4], strides = [1, 1, 1]} : vector<18x18x4xf32> to vector<16x16x4xf32>
    %15 = vector.shape_cast %14 : vector<16x16x4xf32> to vector<256x4xf32>
    %c0_9 = arith.constant 0 : index
    %c16 = arith.constant 16 : index
    %16 = vector.load %arg7[%c0_9, %c16] : memref<256x36xf32, #tpu.memory_space<vmem>>, vector<256x4xf32>
    tpu.vector_store %arg7[%c0_9, %c16], %15 {strides = array<i32>} : memref<256x36xf32, #tpu.memory_space<vmem>>, vector<256x4xf32>,
    %17 = vector.extract_strided_slice %1 {offsets = [1, 2, 0], sizes = [16, 16, 4], strides = [1, 1, 1]} : vector<18x18x4xf32> to vector<16x16x4xf32>
    %18 = vector.shape_cast %17 : vector<16x16x4xf32> to vector<256x4xf32>
    %c0_10 = arith.constant 0 : index
    %c20 = arith.constant 20 : index
    %19 = vector.load %arg7[%c0_10, %c20] : memref<256x36xf32, #tpu.memory_space<vmem>>, vector<256x4xf32>
    tpu.vector_store %arg7[%c0_10, %c20], %18 {strides = array<i32>} : memref<256x36xf32, #tpu.memory_space<vmem>>, vector<256x4xf32>,
    %20 = vector.extract_strided_slice %1 {offsets = [2, 0, 0], sizes = [16, 16, 4], strides = [1, 1, 1]} : vector<18x18x4xf32> to vector<16x16x4xf32>
    %21 = vector.shape_cast %20 : vector<16x16x4xf32> to vector<256x4xf32>
    %c0_11 = arith.constant 0 : index
    %c24 = arith.constant 24 : index
    %22 = vector.load %arg7[%c0_11, %c24] : memref<256x36xf32, #tpu.memory_space<vmem>>, vector<256x4xf32>
    tpu.vector_store %arg7[%c0_11, %c24], %21 {strides = array<i32>} : memref<256x36xf32, #tpu.memory_space<vmem>>, vector<256x4xf32>,
    %23 = vector.extract_strided_slice %1 {offsets = [2, 1, 0], sizes = [16, 16, 4], strides = [1, 1, 1]} : vector<18x18x4xf32> to vector<16x16x4xf32>
    %24 = vector.shape_cast %23 : vector<16x16x4xf32> to vector<256x4xf32>
    %c0_12 = arith.constant 0 : index
    %c28 = arith.constant 28 : index
    %25 = vector.load %arg7[%c0_12, %c28] : memref<256x36xf32, #tpu.memory_space<vmem>>, vector<256x4xf32>
    tpu.vector_store %arg7[%c0_12, %c28], %24 {strides = array<i32>} : memref<256x36xf32, #tpu.memory_space<vmem>>, vector<256x4xf32>,
    %26 = vector.extract_strided_slice %1 {offsets = [2, 2, 0], sizes = [16, 16, 4], strides = [1, 1, 1]} : vector<18x18x4xf32> to vector<16x16x4xf32>
    %27 = vector.shape_cast %26 : vector<16x16x4xf32> to vector<256x4xf32>
    %c0_13 = arith.constant 0 : index
    %c32 = arith.constant 32 : index
    %28 = vector.load %arg7[%c0_13, %c32] : memref<256x36xf32, #tpu.memory_space<vmem>>, vector<256x4xf32>
    tpu.vector_store %arg7[%c0_13, %c32], %27 {strides = array<i32>} : memref<256x36xf32, #tpu.memory_space<vmem>>, vector<256x4xf32>,
    %c0_14 = arith.constant 0 : index
    %c0_15 = arith.constant 0 : index
    %29 = vector.load %arg7[%c0_14, %c0_15] : memref<256x36xf32, #tpu.memory_space<vmem>>, vector<256x36xf32>
    %c0_16 = arith.constant 0 : index
    %c0_17 = arith.constant 0 : index
    %30 = vector.load %arg4[%c0_16, %c0_17] : memref<36x8xf32, #tpu.memory_space<vmem>>, vector<36x8xf32>
    %cst = arith.constant dense<0.000000e+00> : vector<256x8xf32>
    %31 = tpu.matmul %29, %30, %cst {dimension_numbers = #tpu.dot_dimension_numbers<[1], [0], [0], [1], [0, 0, 1, 1], [], []>} : vector<256x36xf32>, vector<36x8xf32>, vector<256x8xf32> -> vector<256x8xf32>
    %c0_18 = arith.constant 0 : index
    %c0_19 = arith.constant 0 : index
    %c0_20 = arith.constant 0 : index
    %c0_21 = arith.constant 0 : index
    %32 = vector.load %arg5[%c0_18, %c0_19, %c0_20, %c0_21] : memref<1x1x256x8xf32, #tpu.memory_space<vmem>>, vector<1x1x256x8xf32>
    %33 = vector.shape_cast %32 : vector<1x1x256x8xf32> to vector<256x8xf32>
    %34 = vector.shape_cast %31 : vector<256x8xf32> to vector<1x1x256x8xf32>
    tpu.vector_store %arg5[%c0_18, %c0_19, %c0_20, %c0_21], %34 {strides = array<i32>} : memref<1x1x256x8xf32, #tpu.memory_space<vmem>>, vector<1x1x256x8xf32>,
    %cst_22 = arith.constant dense<0.000000e+00> : vector<8xf32>
    %35 = vector.multi_reduction <add>, %31, %cst_22 [0] : vector<256x8xf32> to vector<8xf32>
    %36 = vector.shape_cast %35 : vector<8xf32> to vector<1x8xf32>
    %37 = arith.mulf %31, %31 : vector<256x8xf32>
    %cst_23 = arith.constant dense<0.000000e+00> : vector<8xf32>
    %38 = vector.multi_reduction <add>, %37, %cst_23 [0] : vector<256x8xf32> to vector<8xf32>
    %39 = vector.shape_cast %38 : vector<8xf32> to vector<1x8xf32>
    %cst_24 = arith.constant 0.000000e+00 : f32
    %40 = vector.broadcast %cst_24 : f32 to vector<6x8xf32>
    %41 = tpu.concatenate %36, %39, %40 in 0 : vector<1x8xf32>, vector<1x8xf32>, vector<6x8xf32> -> vector<8x8xf32>
    %c0_25 = arith.constant 0 : index
    %c0_26 = arith.constant 0 : index
    %c0_27 = arith.constant 0 : index
    %c0_28 = arith.constant 0 : index
    %42 = vector.load %arg6[%c0_25, %c0_26, %c0_27, %c0_28] : memref<1x1x8x8xf32, #tpu.memory_space<vmem>>, vector<1x1x8x8xf32>
    %43 = vector.shape_cast %42 : vector<1x1x8x8xf32> to vector<8x8xf32>
    %44 = vector.shape_cast %41 : vector<8x8xf32> to vector<1x1x8x8xf32>
    tpu.vector_store %arg6[%c0_25, %c0_26, %c0_27, %c0_28], %44 {strides = array<i32>} : memref<1x1x8x8xf32, #tpu.memory_space<vmem>>, vector<1x1x8x8xf32>,
    return
  }
  func.func @transform_0(%arg0: i32, %arg1: i32, %arg2: i32) -> (i32, i32, i32, i32, i32) {
    %c0_i32 = arith.constant 0 : i32
    %c0_i32_0 = arith.constant 0 : i32
    %c0_i32_1 = arith.constant 0 : i32
    %c0_i32_2 = arith.constant 0 : i32
    return %arg0, %arg1, %c0_i32, %c0_i32_0, %c0_i32_1 : i32, i32, i32, i32, i32
  }
  func.func @transform_1(%arg0: i32, %arg1: i32, %arg2: i32) -> (i32, i32) {
    %c0_i32 = arith.constant 0 : i32
    %c0_i32_0 = arith.constant 0 : i32
    return %c0_i32, %arg2 : i32, i32
  }
  func.func @transform_2(%arg0: i32, %arg1: i32, %arg2: i32) -> (i32, i32, i32, i32) {
    %c0_i32 = arith.constant 0 : i32
    %c0_i32_0 = arith.constant 0 : i32
    return %arg0, %arg1, %c0_i32, %arg2 : i32, i32, i32, i32
  }
  func.func @transform_3(%arg0: i32, %arg1: i32, %arg2: i32) -> (i32, i32, i32, i32) {
    %c0_i32 = arith.constant 0 : i32
    %c0_i32_0 = arith.constant 0 : i32
    return %arg0, %arg1, %c0_i32, %arg2 : i32, i32, i32, i32
  }
}

</mosaic_0001>

<bundles_post_ra>
// kernel: tpu_custom_call.1
= control target key start
LH: loop header
LB: loop body
LE: loop exit
PB: predicated region body
PF: predicated region fallthrough
CT: control target
= control target key end

     0   :  { %9 = vsyncpa [#allocation4], 0  ;;  %s4232_s0 = inlined_call_operand.vmem [shape: f32[2,1,18,18,4], index: 0, kind: input, shape index: {}]   ;;  %s4233_s1 = inlined_call_operand.vmem [shape: f32[36,8], index: 1, kind: input, shape index: {}]   ;;  %s4234_s2 = inlined_call_operand.vmem [shape: f32[2,1,256,8], index: 2, kind: output, shape index: {0}]   ;;  %s4235_s3 = inlined_call_operand.hbm [shape: f32[2,1,8,8], index: 3, kind: output, shape index: {1}]  }
   0x1   :  { %11 = vsyncpa [#allocation4 + $0x1], 0  ;;  %s2685_s12 = smov 0   ;;  %s2687_s13 = smov 0  }
   0x2   :  { %s2689_s14 = smov 0   ;;  %s2691_s15 = smov 0  }
   0x3   :  { %s2693_s16 = smov 0   ;;  %s2695_s17 = smov 0  }
   0x4 LB: > { %s2355_s18 = sadd.s32 4294967295, %s2654_s17   ;;  %s2356_s19 = sadd.s32 4294967294, %s2654_s17   ;;  %s2654_s17 = sphi %s2695_s17, %s17_s17   ;;  %s2650_s16 = sphi %s2693_s16, %s4374_s16   ;;  %s2646_s15 = sphi %s2691_s15, %s4373_s15   ;;  %s2642_s14 = sphi %s2689_s14, %s4372_s14   ;;  %s2638_s13 = sphi %s2687_s13, %s4371_s13   ;;  %s2634_s12 = sphi %s2685_s12, %s4370_s12  }
   0x5   : > { %s36_s20 = sadd.s32 1, %s2650_s16  ;;  %s131_s21 = sadd.s32 1, %s2642_s14 }
   0x6   : > { %p38_p0 = scmp.ge.s32.totalorder %s36_s20, 2  ;;  %p141_p1 = scmp.ne.s32.totalorder %s2642_s14, %s2638_s13 }
   0x7   : > { %p142_p2 = scmp.eq.s32.totalorder %s2355_s18, 1  ;;  %p147_p3 = scmp.ne.s32.totalorder %s2638_s13, %s2634_s12 }
   0x8   : > { %s4376_s20 = smov (%p38_p0, %s36_s20), 0  ;;  %p148_p5 = scmp.eq.s32.totalorder %s2356_s19, 1 }
   0x9   : > { %p2725_p4 = por %p142_p2, %p141_p1  ;;  %s124_s23 = ssub.s32 %s2650_s16, %s4376_s20 }
   0xa   : > { %p2360_p6 = scmp.ge.s32.totalorder %s2654_s17, 1  ;;  %p129_p7 = scmp.eq.s32.totalorder %s124_s23, 0 }
   0xb   : > { %p2732_p8 = por %p148_p5, %p147_p3  ;;  %p185_p9 = scmp.lt.s32.totalorder %s2654_s17, 3 }
   0xc   : > { %s2738_s25 = scalar_select %p129_p7, %s2642_s14, %s131_s21  }
   0xd   : > { %p186_p10 = pnand %p2360_p6, %p185_p9 }
   0xf   : > { %189 = sbr.rel (%p186_p10) target bundleno = 914 (0x392), region = 28 }
  0x16   : > { %p229_p11 = scmp.lt.s32.totalorder %s2646_s15, 1  ;;  %vm308_vm0 = vcmask 31744   ;;  %vm389_vm1 = vcmask 1046528   ;;  %s2656_s4 = smov 4   ;;  %vm599_vm2 = vcmask 1045504   ;;  %vm566_vm3 = vcmask 64544  }
  0x17   : > { %s2657_s5 = smov 8   ;;  %s2658_s6 = smov 12   ;;  %vm1743_vm4 = vcmask 1043456   ;;  %vm776_vm5 = vcmask 97344   ;;  %vm907_vm6 = vcmask 130144   ;;  %vm1042_vm7 = vcmask 162944  }
  0x18   : > { %s2742_s26 = scalar_select %p229_p11, %s2646_s15, 1  ;;  %vm1176_vm8 = vcmask 195744   ;;  %vm1307_vm9 = vcmask 228544   ;;  %vm1442_vm10 = vcmask 261344   ;;  %vm1576_vm11 = vcmask 294144  }
  0x19   : > { %s2659_s7 = smov 16   ;;  %s2660_s8 = smov 20   ;;  %vm1646_vm12 = vcmask 293888   ;;  %vm1972_vm13 = vcmask 64512   ;;  %vm2175_vm14 = vcmask 1040384   ;;  %vm2177_vm15 = vcmask 1041408  }
  0x1a   : > { %s2512_s27 = smul.u32 432, %s2742_s26  ;;  %s2661_s19 = smov 24  }
  0x1b   : > { %s2662_s29 = smov 28   ;;  %s2663_s9 = smov 32  }
  0x1c   : > { %s2748_s30 = scalar_lea.vmem %s4232_s0, %s2512_s27  ;;  %s2399_s11 = sshll.u32 %s2646_s15, 7 }
  0x1d   : > { %v2751_v0 = vld [vmem:[%s2748_s30 + $0x18] sm:$0xff]  ;;  %v2754_v1 = vld [vmem:[%s2748_s30 + $0x20] sm:$0xff]  ;;  %v2762_v5 = vld [vmem:[%s2748_s30 + $0x8] sm:$0xff]  ;;  %s4184_s27 = scalar_lea.hbm %s4235_s3, %s2399_s11 }
  0x1e   : > { %v2757_v2 = vld [vmem:[%s2748_s30] sm:$0xff]  ;;  %v395_v3 = vrot.slane %v2751_v0, 1  ;;  %v396_v4 = vrot.slane %v2754_v1, 1  ;;  %v2766_v7 = vld [vmem:[%s2748_s30 + $0x28] sm:$0x3]  ;;  %311 = vst.msk [vmem:[#allocation2 + $0x10] sm:$0xff] %vm308_vm0, %v2751_v0 }
  0x1f   : > { %v390_v6 = vrot.slane %v2757_v2, 1  ;;  %309 = vst.msk [vmem:[#allocation2] sm:$0xff] %vm308_vm0, %v2757_v2  ;;  %312 = vst.msk [vmem:[#allocation2 + $0x18] sm:$0xff] %vm308_vm0, %v2754_v1  ;;  %v391_v8 = vrot.slane %v2762_v5, 1  ;;  %v398_v9 = vrot.slane %v2766_v7, 1  ;;  %v2780_v11 = vld [vmem:[%s2748_s30 + $0x38] sm:$0xff] }
  0x20   : > { %v2777_v10 = vld [vmem:[%s2748_s30 + $0x10] sm:$0x3]  ;;  %310 = vst.msk [vmem:[#allocation2 + $0x8] sm:$0xff] %vm308_vm0, %v2762_v5  ;;  %v2788_v13 = vsel %vm389_vm1, %v395_v3, %v396_v4  ;;  %v2792_v15 = vld [vmem:[%s2748_s30 + $0x40] sm:$0x3]  ;;  %314 = vst.msk [vmem:[#allocation2 + $0x28] sm:$0xff] %vm308_vm0, %v2780_v11 }
  0x21   : > { %v2783_v12 = vld [vmem:[%s2748_s30 + $0x30] sm:$0xff]  ;;  %v393_v14 = vrot.slane %v2777_v10, 1  ;;  %474 = vrot.lane.b32.xlu1 %v2788_v13, %s2656_s4  ;;  %v392_v17 = vsel %vm389_vm1, %v390_v6, %v391_v8  ;;  %v2805_v18 = vld [vmem:[%s2748_s30 + $0x48] sm:$0xff]  ;;  %v2814_v20 = vsel %vm389_vm1, %v396_v4, %v398_v9  ;;  %v401_v21 = vrot.slane %v2780_v11, 1  ;;  %v2819_v23 = vld [vmem:[%s2748_s30 + $0x60] sm:$0xff] }
  0x22   : > { %v2795_v16 = vld [vmem:[%s2748_s30 + $0x50] sm:$0xff]  ;;  %313 = vst.msk [vmem:[#allocation2 + $0x20] sm:$0xff] %vm308_vm0, %v2783_v12  ;;  %v2808_v19 = vld [vmem:[%s2748_s30 + $0x68] sm:$0xff]  ;;  %470 = vrot.lane.b32.xlu0 %v392_v17, %s2656_s4  ;;  %v403_v22 = vrot.slane %v2792_v15, 1  ;;  %v2822_v24 = vld [vmem:[%s2748_s30 + $0x80] sm:$0xff]  ;;  %v400_v26 = vrot.slane %v2783_v12, 1 }
  0x23   : > { %316 = vst.msk [vmem:[#allocation2 + $0x38] sm:$0xff] %vm308_vm0, %v2795_v16  ;;  %315 = vst.msk [vmem:[#allocation2 + $0x30] sm:$0xff] %vm308_vm0, %v2805_v18  ;;  %v394_v25 = vsel %vm389_vm1, %v391_v8, %v393_v14  ;;  %v2831_v27 = vld [vmem:[%s2748_s30 + $0x58] sm:$0x3]  ;;  %v2844_v30 = vld [vmem:[%s2748_s30 + $0x90] sm:$0xff]  ;;  %v406_v34 = vrot.slane %v2795_v16, 1 }
  0x24   : > { %318 = vst.msk [vmem:[#allocation2 + $0x48] sm:$0xff] %vm308_vm0, %v2808_v19  ;;  %v2834_v28 = vld [vmem:[%s2748_s30 + $0x78] sm:$0xff]  ;;  %317 = vst.msk [vmem:[#allocation2 + $0x40] sm:$0xff] %vm308_vm0, %v2819_v23  ;;  %v2851_v31 = vld [vmem:[%s2748_s30 + $0xb0] sm:$0xff]  ;;  %v2862_v33 = vsel %vm389_vm1, %v401_v21, %v403_v22  ;;  %v408_v35 = vrot.slane %v2831_v27, 1  ;;  %v2877_v38 = vsel %vm389_vm1, %v400_v26, %v401_v21  ;;  %v405_v39 = vrot.slane %v2805_v18, 1 }
  0x25   : > { %320 = vst.msk [vmem:[#allocation2 + $0x58] sm:$0xff] %vm308_vm0, %v2822_v24  ;;  %v2841_v29 = vld [vmem:[%s2748_s30 + $0x98] sm:$0xff]  ;;  %319 = vst.msk [vmem:[#allocation2 + $0x50] sm:$0xff] %vm308_vm0, %v2834_v28  ;;  %476 = vrot.lane.b32.xlu1 %v2814_v20, %s2656_s4  ;;  %v2854_v32 = vld [vmem:[%s2748_s30 + $0xa8] sm:$0xff]  ;;  %v411_v48 = vrot.slane %v2808_v19, 1  ;;  %v410_v53 = vrot.slane %v2819_v23, 1 }
  0x26   : > { %321 = vst.msk [vmem:[#allocation2 + $0x60] sm:$0xff] %vm308_vm0, %v2844_v30  ;;  %322 = vst.msk [vmem:[#allocation2 + $0x68] sm:$0xff] %vm308_vm0, %v2841_v29  ;;  %472 = vrot.lane.b32.xlu0 %v394_v25, %s2656_s4  ;;  %v2867_v36 = vld [vmem:[%s2748_s30 + $0x70] sm:$0x3]  ;;  %v2870_v37 = vld [vmem:[%s2748_s30 + $0xc8] sm:$0xff]  ;;  %v2918_v47 = vsel %vm389_vm1, %v406_v34, %v408_v35  ;;  %v2933_v52 = vsel %vm389_vm1, %v405_v39, %v406_v34  ;;  %v416_v60 = vrot.slane %v2822_v24, 1 }
  0x27   : > { %4304 = vst [vmem:[#allocation6_spill] sm:$0xff] %v2870_v37  ;;  %323 = vst.msk [vmem:[#allocation2 + $0x70] sm:$0xff] %vm308_vm0, %v2854_v32  ;;  %v2881_v40 = vld [vmem:[%s2748_s30 + $0xc0] sm:$0xff]  ;;  %v2887_v42 = vld [vmem:[%s2748_s30 + $0xd8] sm:$0xff]  ;;  %v413_v49 = vrot.slane %v2867_v36, 1  ;;  %v2979_v3 = vsel %vm389_vm1, %v410_v53, %v411_v48  ;;  %v415_v4 = vrot.slane %v2834_v28, 1 }
  0x28   : > { %324 = vst.msk [vmem:[#allocation2 + $0x78] sm:$0xff] %vm308_vm0, %v2851_v31  ;;  %v2884_v41 = vld [vmem:[%s2748_s30 + $0xe0] sm:$0xff]  ;;  %326 = vst.msk [vmem:[#allocation2 + $0x88] sm:$0xff] %vm308_vm0, %v2870_v37  ;;  %v2892_v43 = vld [vmem:[%s2748_s30 + $0xf8] sm:$0xff]  ;;  %v421_v9 = vrot.slane %v2841_v29, 1  ;;  %v420_v21 = vrot.slane %v2844_v30, 1 }
  0x29   : > { %4305 = vst [vmem:[#allocation7_spill] sm:$0xff] %v2884_v41  ;;  %4306 = vst [vmem:[#allocation8_spill] sm:$0xff] %v2892_v43  ;;  %v2895_v44 = vld [vmem:[%s2748_s30 + $0xf0] sm:$0xff]  ;;  %480 = vrot.lane.b32.xlu1 %v2862_v33, %s2656_s4  ;;  %v2909_v46 = vld [vmem:[%s2748_s30 + $0x108] sm:$0xff]  ;;  %v2964_v59 = vsel %vm389_vm1, %v411_v48, %v413_v49  ;;  %v2999_v17 = vsel %vm389_vm1, %v415_v4, %v416_v60  ;;  %v426_v26 = vrot.slane %v2851_v31, 1  ;;  %v425_v39 = vrot.slane %v2854_v32, 1 }
  0x2a   : > { %325 = vst.msk [vmem:[#allocation2 + $0x80] sm:$0xff] %vm308_vm0, %v2881_v40  ;;  %327 = vst.msk [vmem:[#allocation2 + $0x90] sm:$0xff] %vm308_vm0, %v2887_v42  ;;  %v2906_v45 = vld [vmem:[%s2748_s30 + $0x110] sm:$0xff]  ;;  %478 = vrot.lane.b32.xlu0 %v2877_v38, %s2656_s4  ;;  %v2923_v50 = vld [vmem:[%s2748_s30 + $0x128] sm:$0xff]  ;;  %v3015_v35 = vsel %vm389_vm1, %v420_v21, %v421_v9  ;;  %v431_v53 = vrot.slane %v2870_v37, 1  ;;  %v430_v4 = vrot.slane %v2881_v40, 1 }
  0x2b   : > { %328 = vst.msk [vmem:[#allocation2 + $0x98] sm:$0xff] %vm308_vm0, %v2884_v41  ;;  %4307 = vst [vmem:[#allocation9_spill] sm:$0xff] %v2906_v45  ;;  %v2926_v51 = vld [vmem:[%s2748_s30 + $0x120] sm:$0xff]  ;;  %v2937_v54 = vld [vmem:[%s2748_s30 + $0x88] sm:$0x3]  ;;  %v436_v21 = vrot.slane %v2884_v41, 1 }
  0x2c   : > { %329 = vst.msk [vmem:[#allocation2 + $0xa0] sm:$0xff] %vm308_vm0, %v2895_v44  ;;  %330 = vst.msk [vmem:[#allocation2 + $0xa8] sm:$0xff] %vm308_vm0, %v2892_v43  ;;  %v2940_v55 = vld [vmem:[%s2748_s30 + $0x140] sm:$0xff]  ;;  %v2947_v56 = vld [vmem:[%s2748_s30 + $0x138] sm:$0xff]  ;;  %v418_v61 = vrot.slane %v2937_v54, 1 }
  0x2d   : > { %4308 = vst [vmem:[#allocation10_spill] sm:$0xff] %v2918_v47  ;;  %4309 = vst [vmem:[#allocation11_spill] sm:$0xff] %v2923_v50  ;;  %484 = vrot.lane.b32.xlu1 %v2918_v47, %s2656_s4  ;;  %v2954_v57 = vld [vmem:[%s2748_s30 + $0x158] sm:$0xff]  ;;  %v2957_v58 = vld [vmem:[%s2748_s30 + $0x150] sm:$0xff] }
  0x2e   : > { %331 = vst.msk [vmem:[#allocation2 + $0xb0] sm:$0xff] %vm308_vm0, %v2909_v46  ;;  %332 = vst.msk [vmem:[#allocation2 + $0xb8] sm:$0xff] %vm308_vm0, %v2906_v45  ;;  %482 = vrot.lane.b32.xlu0 %v2933_v52, %s2656_s4  ;;  %v2969_v62 = vld [vmem:[%s2748_s30 + $0x170] sm:$0xff]  ;;  %v2972_v63 = vld [vmem:[%s2748_s30 + $0x168] sm:$0xff]  ;;  %v2994_v8 = vsel %vm389_vm1, %v416_v60, %v418_v61  ;;  %v3031_v61 = vsel %vm389_vm1, %v425_v39, %v426_v26  ;;  %v435_v39 = vrot.slane %v2887_v42, 1 }
  0x2f   : > { %4310 = vst [vmem:[#allocation12_spill] sm:$0xff] %v2940_v55  ;;  %333 = vst.msk [vmem:[#allocation2 + $0xc0] sm:$0xff] %vm308_vm0, %v2926_v51  ;;  %v2983_v6 = vld [vmem:[%s2748_s30 + $0xa0] sm:$0x3]  ;;  %v3003_v22 = vld [vmem:[%s2748_s30 + $0xb8] sm:$0x3] }
  0x30   : > { %334 = vst.msk [vmem:[#allocation2 + $0xc8] sm:$0xff] %vm308_vm0, %v2923_v50  ;;  %4311 = vst [vmem:[#allocation13_spill] sm:$0xff] %v2947_v56  ;;  %v423_v14 = vrot.slane %v2983_v6, 1  ;;  %v428_v34 = vrot.slane %v3003_v22, 1  ;;  %v3019_v48 = vld [vmem:[%s2748_s30 + $0xd0] sm:$0x3] }
  0x31   : > { %336 = vst.msk [vmem:[#allocation2 + $0xd8] sm:$0xff] %vm308_vm0, %v2940_v55  ;;  %4312 = vst [vmem:[#allocation14_spill] sm:$0xff] %v2954_v57  ;;  %488 = vrot.lane.b32.xlu1 %v2964_v59, %s2656_s4  ;;  %v433_v60 = vrot.slane %v3019_v48, 1 }
  0x32   : > { %335 = vst.msk [vmem:[#allocation2 + $0xd0] sm:$0xff] %vm308_vm0, %v2947_v56  ;;  %4313 = vst [vmem:[#allocation15_spill] sm:$0xff] %v2964_v59  ;;  %486 = vrot.lane.b32.xlu0 %v2979_v3, %s2656_s4  ;;  %v3010_v25 = vsel %vm389_vm1, %v421_v9, %v423_v14  ;;  %v3026_v49 = vsel %vm389_vm1, %v426_v26, %v428_v34  ;;  %v3035_v9 = vld [vmem:[%s2748_s30 + $0xe8] sm:$0x3]  ;;  %v3047_v26 = vsel %vm389_vm1, %v430_v4, %v431_v53  ;;  %v3115_v59 = vld [vmem:[%s2748_s30 + $0x160] sm:$0x3] }
  0x33   : > { %337 = vst.msk [vmem:[#allocation2 + $0xe0] sm:$0xff] %vm308_vm0, %v2957_v58  ;;  %338 = vst.msk [vmem:[#allocation2 + $0xe8] sm:$0xff] %vm308_vm0, %v2954_v57  ;;  %v3042_v14 = vsel %vm389_vm1, %v431_v53, %v433_v60  ;;  %v438_v34 = vrot.slane %v3035_v9, 1  ;;  %v3063_v53 = vsel %vm389_vm1, %v435_v39, %v436_v21  ;;  %v440_v4 = vrot.slane %v2895_v44, 1 }
  0x34   : > { %4314 = vst [vmem:[#allocation16_spill] sm:$0xff] %v2979_v3  ;;  %339 = vst.msk [vmem:[#allocation2 + $0xf0] sm:$0xff] %vm308_vm0, %v2972_v63  ;;  %v445_v39 = vrot.slane %v2909_v46, 1  ;;  %v3131_v3 = vld [vmem:[%s2748_s30 + $0x178] sm:$0x3] }
  0x35   : > { %340 = vst.msk [vmem:[#allocation2 + $0xf8] sm:$0xff] %vm308_vm0, %v2969_v62  ;;  %4315 = vst [vmem:[#allocation17_spill] sm:$0xff] %v2994_v8  ;;  %492 = vrot.lane.b32.xlu1 %v2994_v8, %s2656_s4  ;;  %v3058_v60 = vsel %vm389_vm1, %v436_v21, %v438_v34  ;;  %v3083_v8 = vld [vmem:[%s2748_s30 + $0x130] sm:$0x3] }
  0x36   : > { %4316 = vst [vmem:[#allocation18_spill] sm:$0xff] %v2999_v17  ;;  %490 = vrot.lane.b32.xlu0 %v2999_v17, %s2656_s4  ;;  %4317 = vst [vmem:[#allocation19_spill] sm:$0xff] %v3010_v25  ;;  %v3099_v17 = vld [vmem:[%s2748_s30 + $0x148] sm:$0x3] }
  0x37   : > { %4318 = vst [vmem:[#allocation20_spill] sm:$0xff] %v3015_v35  ;;  %4319 = vst [vmem:[#allocation21_spill] sm:$0xff] %v3026_v49 }
  0x38   : > { %4320 = vst [vmem:[#allocation22_spill] sm:$0xff] %v3031_v61  ;;  %4321 = vst [vmem:[#allocation23_spill] sm:$0xff] %v3042_v14 }
  0x39   : > { %496 = vrot.lane.b32.xlu1 %v3010_v25, %s2656_s4  ;;  %4322 = vst [vmem:[#allocation24_spill] sm:$0xff] %v3047_v26  ;;  %v3051_v25 = vld [vmem:[%s2748_s30 + $0x100] sm:$0x3]  ;;  %4323 = vst [vmem:[#allocation25_spill] sm:$0xff] %v3058_v60 }
  0x3a   : > { %494 = vrot.lane.b32.xlu0 %v3015_v35, %s2656_s4  ;;  %4324 = vst [vmem:[#allocation26_spill] sm:$0xff] %v3063_v53  ;;  %v3067_v35 = vld [vmem:[%s2748_s30 + $0x118] sm:$0x3] }
  0x3d   : > { %500 = vrot.lane.b32.xlu1 %v3026_v49, %s2656_s4  ;;  %v441_v49 = vrot.slane %v2892_v43, 1 }
  0x3e   : > { %498 = vrot.lane.b32.xlu0 %v3031_v61, %s2656_s4  ;;  %v443_v61 = vrot.slane %v3051_v25, 1 }
  0x3f   : > { %v3079_v21 = vsel %vm389_vm1, %v440_v4, %v441_v49  ;;  %v450_v4 = vrot.slane %v2926_v51, 1 }
  0x40   : > { %v3074_v34 = vsel %vm389_vm1, %v441_v49, %v443_v61  ;;  %4326 = vst [vmem:[#allocation28_spill] sm:$0xff] %v3079_v21 }
  0x41   : > { %504 = vrot.lane.b32.xlu1 %v3042_v14, %s2656_s4  ;;  %4325 = vst [vmem:[#allocation27_spill] sm:$0xff] %v3074_v34  ;;  %v446_v14 = vrot.slane %v2906_v45, 1 }
  0x42   : > { %502 = vrot.lane.b32.xlu0 %v3047_v26, %s2656_s4  ;;  %v448_v26 = vrot.slane %v3067_v35, 1 }
  0x43   : > { %v3095_v49 = vsel %vm389_vm1, %v445_v39, %v446_v14  ;;  %v455_v39 = vrot.slane %v2947_v56, 1 }
  0x44   : > { %v3090_v61 = vsel %vm389_vm1, %v446_v14, %v448_v26  ;;  %4328 = vst [vmem:[#allocation30_spill] sm:$0xff] %v3095_v49 }
  0x45   : > { %508 = vrot.lane.b32.xlu1 %v3058_v60, %s2656_s4  ;;  %4327 = vst [vmem:[#allocation29_spill] sm:$0xff] %v3090_v61  ;;  %v451_v60 = vrot.slane %v2923_v50, 1 }
  0x46   : > { %506 = vrot.lane.b32.xlu0 %v3063_v53, %s2656_s4  ;;  %v453_v53 = vrot.slane %v3083_v8, 1 }
  0x47   : > { %v3111_v14 = vsel %vm389_vm1, %v450_v4, %v451_v60  ;;  %v460_v4 = vrot.slane %v2957_v58, 1 }
  0x48   : > { %v3106_v26 = vsel %vm389_vm1, %v451_v60, %v453_v53  ;;  %4330 = vst [vmem:[#allocation32_spill] sm:$0xff] %v3111_v14 }
  0x49   : > { %512 = vrot.lane.b32.xlu1 %v3074_v34, %s2656_s4  ;;  %4329 = vst [vmem:[#allocation31_spill] sm:$0xff] %v3106_v26  ;;  %v456_v34 = vrot.slane %v2940_v55, 1 }
  0x4a   : > { %510 = vrot.lane.b32.xlu0 %v3079_v21, %s2656_s4  ;;  %v458_v21 = vrot.slane %v3099_v17, 1 }
  0x4b   : > { %v3127_v60 = vsel %vm389_vm1, %v455_v39, %v456_v34  ;;  %v465_v39 = vrot.slane %v2972_v63, 1 }
  0x4c   : > { %v3122_v53 = vsel %vm389_vm1, %v456_v34, %v458_v21  ;;  %4332 = vst [vmem:[#allocation34_spill] sm:$0xff] %v3127_v60 }
  0x4d   : > { %516 = vrot.lane.b32.xlu1 %v3090_v61, %s2656_s4  ;;  %4331 = vst [vmem:[#allocation33_spill] sm:$0xff] %v3122_v53  ;;  %v461_v61 = vrot.slane %v2954_v57, 1 }
  0x4e   : > { %514 = vrot.lane.b32.xlu0 %v3095_v49, %s2656_s4  ;;  %v463_v49 = vrot.slane %v3115_v59, 1 }
  0x4f   : > { %v3143_v34 = vsel %vm389_vm1, %v460_v4, %v461_v61 }
  0x50   : > { %v3138_v21 = vsel %vm389_vm1, %v461_v61, %v463_v49  ;;  %4334 = vst [vmem:[#allocation36_spill] sm:$0xff] %v3143_v34  ;;  %v601_v49 = vrot.slane %v2762_v5, 2  ;;  %v600_v61 = vrot.slane %v2757_v2, 2  ;;  %v608_v5 = vrot.slane %v2766_v7, 2 }
  0x51   : > { %520 = vrot.lane.b32.xlu1 %v3106_v26, %s2656_s4  ;;  %4333 = vst [vmem:[#allocation35_spill] sm:$0xff] %v3138_v21  ;;  %v466_v26 = vrot.slane %v2969_v62, 1  ;;  %v610_v7 = vrot.slane %v2783_v12, 2 }
  0x52   : > { %518 = vrot.lane.b32.xlu0 %v3111_v14, %s2656_s4  ;;  %v468_v14 = vrot.slane %v3131_v3, 1 }
  0x53   : > { %v3156_v47 = vsel %vm389_vm1, %v465_v39, %v466_v26  ;;  %v611_v39 = vrot.slane %v2780_v11, 2 }
  0x54   : > { %4336 = vst [vmem:[#allocation38_spill] sm:$0xff] %v3156_v47 }
  0x55   : > { %524 = vrot.lane.b32.xlu1 %v3122_v53, %s2656_s4  ;;  %v3151_v53 = vsel %vm389_vm1, %v466_v26, %v468_v14  ;;  %v606_v14 = vrot.slane %v2754_v1, 2  ;;  %v605_v26 = vrot.slane %v2751_v0, 2 }
  0x56   : > { %522 = vrot.lane.b32.xlu0 %v3127_v60, %s2656_s4  ;;  %4335 = vst [vmem:[#allocation37_spill] sm:$0xff] %v3151_v53  ;;  %v603_v60 = vrot.slane %v2777_v10, 2  ;;  %v602_v10 = vsel %vm599_vm2, %v600_v61, %v601_v49  ;;  %v616_v61 = vrot.slane %v2795_v16, 2 }
  0x57   : > { %v3171_v2 = vsel %vm599_vm2, %v606_v14, %v608_v5 }
  0x58   : > { %v604_v4 = vsel %vm599_vm2, %v601_v49, %v603_v60  ;;  %v613_v60 = vrot.slane %v2792_v15, 2  ;;  %v3189_v15 = vsel %vm599_vm2, %v610_v7, %v611_v39  ;;  %v626_v7 = vrot.slane %v2822_v24, 2 }
  0x59   : > { %528 = vrot.lane.b32.xlu1 %v3138_v21, %s2656_s4  ;;  %v638_v21 = vrot.slane %v3003_v22, 2 }
  0x5a   : > { %526 = vrot.lane.b32.xlu0 %v3143_v34, %s2656_s4  ;;  %v3184_v49 = vsel %vm599_vm2, %v611_v39, %v613_v60  ;;  %v620_v39 = vrot.slane %v2819_v23, 2  ;;  %v643_v34 = vrot.slane %v3019_v48, 2 }
  0x5d   : > { %532 = vrot.lane.b32.xlu1 %v3151_v53, %s2656_s4  ;;  %v3176_v53 = vsel %vm599_vm2, %v605_v26, %v606_v14  ;;  %v615_v14 = vrot.slane %v2805_v18, 2  ;;  %v623_v26 = vrot.slane %v2867_v36, 2 }
  0x5e   : > { %530 = vrot.lane.b32.xlu0 %v3156_v47, %s2656_s4  ;;  %v633_v47 = vrot.slane %v2983_v6, 2 }
  0x61   : > { %682 = vrot.lane.b32.xlu1 %v604_v4, %s2657_s5  ;;  %v618_v4 = vrot.slane %v2831_v27, 2  ;;  %v3202_v27 = vsel %vm599_vm2, %v615_v14, %v616_v61 }
  0x62   : > { %680 = vrot.lane.b32.xlu0 %v602_v10, %s2657_s5  ;;  %v621_v10 = vrot.slane %v2808_v19, 2 }
  0x63   : > { %v3197_v5 = vsel %vm599_vm2, %v616_v61, %v618_v4  ;;  %v628_v4 = vrot.slane %v2937_v54, 2  ;;  %v625_v61 = vrot.slane %v2834_v28, 2 }
  0x64   : > { %v3210_v60 = vsel %vm599_vm2, %v621_v10, %v623_v26  ;;  %v3215_v36 = vsel %vm599_vm2, %v620_v39, %v621_v10  ;;  %v631_v26 = vrot.slane %v2841_v29, 2  ;;  %v630_v10 = vrot.slane %v2844_v30, 2 }
  0x65   : > { %686 = vrot.lane.b32.xlu1 %v3171_v2, %s2657_s5  ;;  %v3223_v14 = vsel %vm599_vm2, %v626_v7, %v628_v4  ;;  %v3228_v54 = vsel %vm599_vm2, %v625_v61, %v626_v7  ;;  %v636_v4 = vrot.slane %v2851_v31, 2  ;;  %v635_v7 = vrot.slane %v2854_v32, 2 }
  0x66   : > { %684 = vrot.lane.b32.xlu0 %v3176_v53, %s2657_s5  ;;  %v3236_v39 = vsel %vm599_vm2, %v631_v26, %v633_v47  ;;  %v3241_v6 = vsel %vm599_vm2, %v630_v10, %v631_v26  ;;  %v641_v47 = vrot.slane %v2870_v37, 2  ;;  %v640_v26 = vrot.slane %v2881_v40, 2 }
  0x67   : > { %v3249_v61 = vsel %vm599_vm2, %v636_v4, %v638_v21  ;;  %v3254_v22 = vsel %vm599_vm2, %v635_v7, %v636_v4  ;;  %v646_v21 = vrot.slane %v2884_v41, 2  ;;  %v648_v37 = vrot.slane %v3035_v9, 2 }
  0x68   : > { %v3262_v10 = vsel %vm599_vm2, %v641_v47, %v643_v34  ;;  %v3267_v48 = vsel %vm599_vm2, %v640_v26, %v641_v47  ;;  %v645_v4 = vrot.slane %v2887_v42, 2  ;;  %v651_v34 = vrot.slane %v2892_v43, 2 }
  0x69   : > { %690 = vrot.lane.b32.xlu1 %v3184_v49, %s2657_s5  ;;  %v3275_v7 = vsel %vm599_vm2, %v646_v21, %v648_v37  ;;  %v653_v41 = vrot.slane %v3051_v25, 2  ;;  %v650_v47 = vrot.slane %v2895_v44, 2  ;;  %v656_v37 = vrot.slane %v2906_v45, 2 }
  0x6a   : > { %688 = vrot.lane.b32.xlu0 %v3189_v15, %s2657_s5  ;;  %v3280_v9 = vsel %vm599_vm2, %v645_v4, %v646_v21  ;;  %v658_v43 = vrot.slane %v3067_v35, 2  ;;  %v655_v21 = vrot.slane %v2909_v46, 2  ;;  %v663_v45 = vrot.slane %v3083_v8, 2 }
  0x6b   : > { %v3288_v26 = vsel %vm599_vm2, %v651_v34, %v653_v41  ;;  %v3293_v25 = vsel %vm599_vm2, %v650_v47, %v651_v34  ;;  %v661_v41 = vrot.slane %v2923_v50, 2  ;;  %v660_v34 = vrot.slane %v2926_v51, 2 }
  0x6c   : > { %v3301_v4 = vsel %vm599_vm2, %v656_v37, %v658_v43  ;;  %v3306_v35 = vsel %vm599_vm2, %v655_v21, %v656_v37  ;;  %v666_v43 = vrot.slane %v2940_v55, 2  ;;  %v668_v50 = vrot.slane %v3099_v17, 2 }
  0x6d   : > { %694 = vrot.lane.b32.xlu1 %v3197_v5, %s2657_s5  ;;  %v3314_v47 = vsel %vm599_vm2, %v661_v41, %v663_v45  ;;  %v3319_v8 = vsel %vm599_vm2, %v660_v34, %v661_v41  ;;  %v665_v37 = vrot.slane %v2947_v56, 2  ;;  %v671_v45 = vrot.slane %v2954_v57, 2 }
  0x6e   : > { %692 = vrot.lane.b32.xlu0 %v3202_v27, %s2657_s5  ;;  %v3327_v21 = vsel %vm599_vm2, %v666_v43, %v668_v50  ;;  %v673_v55 = vrot.slane %v3115_v59, 2  ;;  %v670_v34 = vrot.slane %v2957_v58, 2  ;;  %v676_v59 = vrot.slane %v2969_v62, 2 }
  0x6f   : > { %v3332_v41 = vsel %vm599_vm2, %v665_v37, %v666_v43  ;;  %v678_v43 = vrot.slane %v3131_v3, 2 }
  0x70   : > { %v3342_v50 = vsel %vm599_vm2, %v671_v45, %v673_v55  ;;  %v3347_v57 = vsel %vm599_vm2, %v670_v34, %v671_v45 }
  0x71   : > { %698 = vrot.lane.b32.xlu1 %v3210_v60, %s2657_s5  ;;  %v3357_v55 = vsel %vm599_vm2, %v676_v59, %v678_v43 }
  0x72   : > { %696 = vrot.lane.b32.xlu0 %v3215_v36, %s2657_s5 }
  0x75   : > { %702 = vrot.lane.b32.xlu1 %v3223_v14, %s2657_s5 }
  0x76   : > { %700 = vrot.lane.b32.xlu0 %v3228_v54, %s2657_s5 }
  0x79   : > { %706 = vrot.lane.b32.xlu1 %v3236_v39, %s2657_s5 }
  0x7a   : > { %704 = vrot.lane.b32.xlu0 %v3241_v6, %s2657_s5 }
  0x7d   : > { %710 = vrot.lane.b32.xlu1 %v3249_v61, %s2657_s5 }
  0x7e   : > { %708 = vrot.lane.b32.xlu0 %v3254_v22, %s2657_s5 }
  0x81   : > { %714 = vrot.lane.b32.xlu1 %v3262_v10, %s2657_s5 }
  0x82   : > { %712 = vrot.lane.b32.xlu0 %v3267_v48, %s2657_s5 }
  0x85   : > { %718 = vrot.lane.b32.xlu1 %v3275_v7, %s2657_s5 }
  0x86   : > { %716 = vrot.lane.b32.xlu0 %v3280_v9, %s2657_s5 }
  0x89   : > { %722 = vrot.lane.b32.xlu1 %v3288_v26, %s2657_s5 }
  0x8a   : > { %720 = vrot.lane.b32.xlu0 %v3293_v25, %s2657_s5 }
  0x8d   : > { %726 = vrot.lane.b32.xlu1 %v3301_v4, %s2657_s5 }
  0x8e   : > { %724 = vrot.lane.b32.xlu0 %v3306_v35, %s2657_s5 }
  0x91   : > { %730 = vrot.lane.b32.xlu1 %v3314_v47, %s2657_s5 }
  0x92   : > { %728 = vrot.lane.b32.xlu0 %v3319_v8, %s2657_s5 }
  0x93   : > { %v475_v17 = vpop.permute.xlu1 %474 }
  0x94   : > { %569 = vst.msk [vmem:[#allocation2 + $0x10] sm:$0xff] %vm566_vm3, %v475_v17  ;;  %v471_v56 = vpop.permute.xlu0 %470  ;;  %v675_v17 = vrot.slane %v2972_v63, 2 }
  0x95   : > { %567 = vst.msk [vmem:[#allocation2] sm:$0xff] %vm566_vm3, %v471_v56  ;;  %734 = vrot.lane.b32.xlu1 %v3327_v21, %s2657_s5 }
  0x96   : > { %732 = vrot.lane.b32.xlu0 %v3332_v41, %s2657_s5  ;;  %v3360_v45 = vsel %vm599_vm2, %v675_v17, %v676_v59 }
  0x97   : > { %v477_v37 = vpop.permute.xlu1 %476 }
  0x98   : > { %570 = vst.msk [vmem:[#allocation2 + $0x18] sm:$0xff] %vm566_vm3, %v477_v37  ;;  %v473_v56 = vpop.permute.xlu0 %472 }
  0x99   : > { %568 = vst.msk [vmem:[#allocation2 + $0x8] sm:$0xff] %vm566_vm3, %v473_v56  ;;  %738 = vrot.lane.b32.xlu1 %v3342_v50, %s2657_s5 }
  0x9a   : > { %736 = vrot.lane.b32.xlu0 %v3347_v57, %s2657_s5 }
  0x9b   : > { %v481_v3 = vpop.permute.xlu1 %480 }
  0x9c   : > { %572 = vst.msk [vmem:[#allocation2 + $0x28] sm:$0xff] %vm566_vm3, %v481_v3  ;;  %v479_v34 = vpop.permute.xlu0 %478 }
  0x9d   : > { %571 = vst.msk [vmem:[#allocation2 + $0x20] sm:$0xff] %vm566_vm3, %v479_v34  ;;  %742 = vrot.lane.b32.xlu1 %v3357_v55, %s2657_s5 }
  0x9e   : > { %740 = vrot.lane.b32.xlu0 %v3360_v45, %s2657_s5 }
  0x9f   : > { %v485_v37 = vpop.permute.xlu1 %484 }
  0xa0   : > { %574 = vst.msk [vmem:[#allocation2 + $0x38] sm:$0xff] %vm566_vm3, %v485_v37  ;;  %v483_v43 = vpop.permute.xlu0 %482 }
  0xa1   : > { %573 = vst.msk [vmem:[#allocation2 + $0x30] sm:$0xff] %vm566_vm3, %v483_v43  ;;  %813 = vrot.lane.b32.xlu1 %v2754_v1, %s2658_s6 }
  0xa2   : > { %811 = vrot.lane.b32.xlu0 %v2751_v0, %s2658_s6 }
  0xa3   : > { %v489_v59 = vpop.permute.xlu1 %488 }
  0xa4   : > { %576 = vst.msk [vmem:[#allocation2 + $0x48] sm:$0xff] %vm566_vm3, %v489_v59  ;;  %v487_v17 = vpop.permute.xlu0 %486 }
  0xa5   : > { %575 = vst.msk [vmem:[#allocation2 + $0x40] sm:$0xff] %vm566_vm3, %v487_v17  ;;  %817 = vrot.lane.b32.xlu1 %v2780_v11, %s2658_s6 }
  0xa6   : > { %815 = vrot.lane.b32.xlu0 %v2783_v12, %s2658_s6 }
  0xa7   : > { %v493_v56 = vpop.permute.xlu1 %492 }
  0xa8   : > { %578 = vst.msk [vmem:[#allocation2 + $0x58] sm:$0xff] %vm566_vm3, %v493_v56  ;;  %v491_v3 = vpop.permute.xlu0 %490  ;;  %v1641_v56 = vld [vmem:[%s4233_s1] sm:$0xff] }
  0xa9   : > { %577 = vst.msk [vmem:[#allocation2 + $0x50] sm:$0xff] %vm566_vm3, %v491_v3  ;;  %821 = vrot.lane.b32.xlu1 %v2795_v16, %s2658_s6  ;;  %v1642_v3 = vld [vmem:[%s4233_s1 + $0x8] sm:$0xff] }
  0xaa   : > { %819 = vrot.lane.b32.xlu0 %v2805_v18, %s2658_s6 }
  0xab   : > { %v497_v0 = vpop.permute.xlu1 %496 }
  0xac   : > { %580 = vst.msk [vmem:[#allocation2 + $0x68] sm:$0xff] %vm566_vm3, %v497_v0  ;;  %v495_v1 = vpop.permute.xlu0 %494 }
  0xad   : > { %579 = vst.msk [vmem:[#allocation2 + $0x60] sm:$0xff] %vm566_vm3, %v495_v1  ;;  %825 = vrot.lane.b32.xlu1 %v2808_v19, %s2658_s6  ;;  %v1643_v1 = vld [vmem:[%s4233_s1 + $0x10] sm:$0xff] }
  0xae   : > { %823 = vrot.lane.b32.xlu0 %v2819_v23, %s2658_s6 }
  0xaf   : > { %v501_v34 = vpop.permute.xlu1 %500 }
  0xb0   : > { %582 = vst.msk [vmem:[#allocation2 + $0x78] sm:$0xff] %vm566_vm3, %v501_v34  ;;  %v499_v37 = vpop.permute.xlu0 %498  ;;  %v1644_v34 = vld [vmem:[%s4233_s1 + $0x18] sm:$0xff] }
  0xb1   : > { %581 = vst.msk [vmem:[#allocation2 + $0x70] sm:$0xff] %vm566_vm3, %v499_v37  ;;  %946 = vrot.lane.b32.xlu1 %v2788_v13, %s2659_s7 }
  0xb2   : > { %827 = vrot.lane.b32.xlu0 %v2834_v28, %s2658_s6 }
  0xb3   : > { %v505_v43 = vpop.permute.xlu1 %504 }
  0xb4   : > { %584 = vst.msk [vmem:[#allocation2 + $0x88] sm:$0xff] %vm566_vm3, %v505_v43  ;;  %v503_v59 = vpop.permute.xlu0 %502 }
  0xb5   : > { %583 = vst.msk [vmem:[#allocation2 + $0x80] sm:$0xff] %vm566_vm3, %v503_v59  ;;  %1080 = vrot.lane.b32.xlu1 %v3176_v53, %s2660_s8  ;;  %v2498_v53 = vpack.c.bf16 %v1642_v3, %v1641_v56 }
  0xb6   : > { %948 = vrot.lane.b32.xlu0 %v2814_v20, %s2659_s7 }
  0xb7   : > { %v509_v17 = vpop.permute.xlu1 %508  ;;  %2499 = vmatprep.subr.bf16.mxu0 %v2498_v53  ;;  %2506 = vmatprep.subr.bf16.mxu1 %v2498_v53 }
  0xb8   : > { %586 = vst.msk [vmem:[#allocation2 + $0x98] sm:$0xff] %vm566_vm3, %v509_v17  ;;  %v507_v13 = vpop.permute.xlu0 %506  ;;  %2501 = vmatpush3.bf16.msra.mxu0 %v2498_v53  ;;  %2509 = vmatpush3.bf16.msra.mxu1 %v2498_v53 }
  0xb9   : > { %585 = vst.msk [vmem:[#allocation2 + $0x90] sm:$0xff] %vm566_vm3, %v507_v13  ;;  %1211 = vrot.lane.b32.xlu1 %v2783_v12, %s2661_s19  ;;  %v2502_v12 = vpack.c.bf16 %v1644_v34, %v1643_v1 }
  0xba   : > { %1082 = vrot.lane.b32.xlu0 %v3171_v2, %s2660_s8 }
  0xbb   : > { %v513_v20 = vpop.permute.xlu1 %512  ;;  %2503 = vmatprep.subr.bf16.mxu0 %v2502_v12  ;;  %2507 = vmatprep.subr.bf16.mxu1 %v2502_v12 }
  0xbc   : > { %588 = vst.msk [vmem:[#allocation2 + $0xa8] sm:$0xff] %vm566_vm3, %v513_v20  ;;  %v511_v0 = vpop.permute.xlu0 %510  ;;  %2505 = vmatpush3.bf16.msra.mxu0 %v2502_v12  ;;  %2510 = vmatpush3.bf16.msra.mxu1 %v2502_v12 }
  0xbd   : > { %587 = vst.msk [vmem:[#allocation2 + $0xa0] sm:$0xff] %vm566_vm3, %v511_v0  ;;  %1346 = vrot.lane.b32.xlu1 %v2877_v38, %s2662_s29 }
  0xbe   : > { %1213 = vrot.lane.b32.xlu0 %v2780_v11, %s2661_s19  ;;  %v1645_v11 = vld [vmem:[%s4233_s1 + $0x20] sm:$0xf] }
  0xbf   : > { %v517_v2 = vpop.permute.xlu1 %516  ;;  %2448 = vmatprep.subr.msk.mxu0 %vm1743_vm4, %v1645_v11  ;;  %2508 = vmatprep.subr.msk.mxu1 %vm1743_vm4, %v1645_v11 }
  0xc0   : > { %590 = vst.msk [vmem:[#allocation2 + $0xb8] sm:$0xff] %vm566_vm3, %v517_v2  ;;  %v515_v37 = vpop.permute.xlu0 %514  ;;  %2449 = vmatpush3.msk.msra.mxu0 %vm1743_vm4, %v1645_v11  ;;  %2511 = vmatpush3.msk.msra.mxu1 %vm1743_vm4, %v1645_v11 }
  0xc1   : > { %589 = vst.msk [vmem:[#allocation2 + $0xb0] sm:$0xff] %vm566_vm3, %v515_v37  ;;  %1348 = vrot.lane.b32.xlu1 %v2862_v33, %s2662_s29 }
  0xc2   : > { %950 = vrot.lane.b32.xlu0 %v2877_v38, %s2659_s7 }
  0xc3   : > { %v521_v43 = vpop.permute.xlu1 %520 }
  0xc4   : > { %592 = vst.msk [vmem:[#allocation2 + $0xc8] sm:$0xff] %vm566_vm3, %v521_v43  ;;  %v519_v59 = vpop.permute.xlu0 %518 }
  0xc5   : > { %591 = vst.msk [vmem:[#allocation2 + $0xc0] sm:$0xff] %vm566_vm3, %v519_v59  ;;  %952 = vrot.lane.b32.xlu1 %v2862_v33, %s2659_s7 }
  0xc6   : > { %1480 = vrot.lane.b32.xlu0 %v3189_v15, %s2663_s9 }
  0xc7   : > { %v525_v38 = vpop.permute.xlu1 %524 }
  0xc8   : > { %594 = vst.msk [vmem:[#allocation2 + $0xd8] sm:$0xff] %vm566_vm3, %v525_v38  ;;  %v523_v17 = vpop.permute.xlu0 %522 }
  0xc9   : > { %593 = vst.msk [vmem:[#allocation2 + $0xd0] sm:$0xff] %vm566_vm3, %v523_v17  ;;  %1482 = vrot.lane.b32.xlu1 %v3184_v49, %s2663_s9 }
  0xca   : > { %1084 = vrot.lane.b32.xlu0 %v3189_v15, %s2660_s8 }
  0xcb   : > { %v529_v13 = vpop.permute.xlu1 %528 }
  0xcc   : > { %596 = vst.msk [vmem:[#allocation2 + $0xe8] sm:$0xff] %vm566_vm3, %v529_v13  ;;  %v527_v33 = vpop.permute.xlu0 %526 }
  0xcd   : > { %595 = vst.msk [vmem:[#allocation2 + $0xe0] sm:$0xff] %vm566_vm3, %v527_v33  ;;  %1215 = vrot.lane.b32.xlu1 %v2805_v18, %s2661_s19 }
  0xce   : > { %1086 = vrot.lane.b32.xlu0 %v3184_v49, %s2660_s8  ;;  %v4337_v49 = vld [vmem:[#allocation10_spill] sm:$0xff] }
  0xcf   : > { %v533_v56 = vpop.permute.xlu1 %532 }
  0xd0   : > { %598 = vst.msk [vmem:[#allocation2 + $0xf8] sm:$0xff] %vm566_vm3, %v533_v56  ;;  %v531_v3 = vpop.permute.xlu0 %530 }
  0xd1   : > { %597 = vst.msk [vmem:[#allocation2 + $0xf0] sm:$0xff] %vm566_vm3, %v531_v3  ;;  %1350 = vrot.lane.b32.xlu1 %v2933_v52, %s2662_s29  ;;  %v4341_v3 = vld [vmem:[#allocation17_spill] sm:$0xff] }
  0xd2   : > { %1217 = vrot.lane.b32.xlu0 %v2795_v16, %s2661_s19 }
  0xd3   : > { %v683_v15 = vpop.permute.xlu1 %682 }
  0xd4   : > { %778 = vst.msk [vmem:[#allocation2 + $0x8] sm:$0xff] %vm776_vm5, %v683_v15  ;;  %v681_v18 = vpop.permute.xlu0 %680 }
  0xd5   : > { %777 = vst.msk [vmem:[#allocation2] sm:$0xff] %vm776_vm5, %v681_v18  ;;  %1352 = vrot.lane.b32.xlu1 %v4337_v49, %s2662_s29 }
  0xd6   : > { %954 = vrot.lane.b32.xlu0 %v2933_v52, %s2659_s7 }
  0xd7   : > { %v687_v53 = vpop.permute.xlu1 %686 }
  0xd8   : > { %780 = vst.msk [vmem:[#allocation2 + $0x18] sm:$0xff] %vm776_vm5, %v687_v53  ;;  %v685_v20 = vpop.permute.xlu0 %684 }
  0xd9   : > { %779 = vst.msk [vmem:[#allocation2 + $0x10] sm:$0xff] %vm776_vm5, %v685_v20  ;;  %956 = vrot.lane.b32.xlu1 %v4337_v49, %s2659_s7 }
  0xda   : > { %1484 = vrot.lane.b32.xlu0 %v3202_v27, %s2663_s9 }
  0xdb   : > { %v691_v16 = vpop.permute.xlu1 %690 }
  0xdc   : > { %782 = vst.msk [vmem:[#allocation2 + $0x28] sm:$0xff] %vm776_vm5, %v691_v16  ;;  %v689_v0 = vpop.permute.xlu0 %688 }
  0xdd   : > { %781 = vst.msk [vmem:[#allocation2 + $0x20] sm:$0xff] %vm776_vm5, %v689_v0  ;;  %1486 = vrot.lane.b32.xlu1 %v3197_v5, %s2663_s9 }
  0xde   : > { %1088 = vrot.lane.b32.xlu0 %v3202_v27, %s2660_s8  ;;  %v4338_v27 = vld [vmem:[#allocation16_spill] sm:$0xff] }
  0xdf   : > { %v695_v52 = vpop.permute.xlu1 %694 }
  0xe0   : > { %784 = vst.msk [vmem:[#allocation2 + $0x38] sm:$0xff] %vm776_vm5, %v695_v52  ;;  %v693_v1 = vpop.permute.xlu0 %692 }
  0xe1   : > { %783 = vst.msk [vmem:[#allocation2 + $0x30] sm:$0xff] %vm776_vm5, %v693_v1  ;;  %1219 = vrot.lane.b32.xlu1 %v2819_v23, %s2661_s19  ;;  %v4339_v23 = vld [vmem:[#allocation15_spill] sm:$0xff] }
  0xe2   : > { %1090 = vrot.lane.b32.xlu0 %v3197_v5, %s2660_s8 }
  0xe3   : > { %v699_v34 = vpop.permute.xlu1 %698 }
  0xe4   : > { %786 = vst.msk [vmem:[#allocation2 + $0x48] sm:$0xff] %vm776_vm5, %v699_v34  ;;  %v697_v12 = vpop.permute.xlu0 %696  ;;  %v4343_v34 = vld [vmem:[#allocation19_spill] sm:$0xff] }
  0xe5   : > { %785 = vst.msk [vmem:[#allocation2 + $0x40] sm:$0xff] %vm776_vm5, %v697_v12  ;;  %1354 = vrot.lane.b32.xlu1 %v4338_v27, %s2662_s29 }
  0xe6   : > { %1221 = vrot.lane.b32.xlu0 %v2808_v19, %s2661_s19 }
  0xe7   : > { %v703_v2 = vpop.permute.xlu1 %702 }
  0xe8   : > { %788 = vst.msk [vmem:[#allocation2 + $0x58] sm:$0xff] %vm776_vm5, %v703_v2  ;;  %v701_v37 = vpop.permute.xlu0 %700 }
  0xe9   : > { %787 = vst.msk [vmem:[#allocation2 + $0x50] sm:$0xff] %vm776_vm5, %v701_v37  ;;  %1356 = vrot.lane.b32.xlu1 %v4339_v23, %s2662_s29 }
  0xea   : > { %958 = vrot.lane.b32.xlu0 %v4338_v27, %s2659_s7 }
  0xeb   : > { %v707_v5 = vpop.permute.xlu1 %706 }
  0xec   : > { %790 = vst.msk [vmem:[#allocation2 + $0x68] sm:$0xff] %vm776_vm5, %v707_v5  ;;  %v705_v11 = vpop.permute.xlu0 %704 }
  0xed   : > { %789 = vst.msk [vmem:[#allocation2 + $0x60] sm:$0xff] %vm776_vm5, %v705_v11  ;;  %960 = vrot.lane.b32.xlu1 %v4339_v23, %s2659_s7 }
  0xee   : > { %1488 = vrot.lane.b32.xlu0 %v3215_v36, %s2663_s9 }
  0xef   : > { %v711_v19 = vpop.permute.xlu1 %710 }
  0xf0   : > { %792 = vst.msk [vmem:[#allocation2 + $0x78] sm:$0xff] %vm776_vm5, %v711_v19  ;;  %v709_v43 = vpop.permute.xlu0 %708 }
  0xf1   : > { %791 = vst.msk [vmem:[#allocation2 + $0x70] sm:$0xff] %vm776_vm5, %v709_v43  ;;  %1490 = vrot.lane.b32.xlu1 %v3210_v60, %s2663_s9 }
  0xf2   : > { %1092 = vrot.lane.b32.xlu0 %v3215_v36, %s2660_s8  ;;  %v4340_v36 = vld [vmem:[#allocation18_spill] sm:$0xff] }
  0xf3   : > { %v715_v59 = vpop.permute.xlu1 %714 }
  0xf4   : > { %794 = vst.msk [vmem:[#allocation2 + $0x88] sm:$0xff] %vm776_vm5, %v715_v59  ;;  %v713_v38 = vpop.permute.xlu0 %712  ;;  %v4345_v59 = vld [vmem:[#allocation21_spill] sm:$0xff] }
  0xf5   : > { %793 = vst.msk [vmem:[#allocation2 + $0x80] sm:$0xff] %vm776_vm5, %v713_v38  ;;  %1223 = vrot.lane.b32.xlu1 %v2834_v28, %s2661_s19 }
  0xf6   : > { %1094 = vrot.lane.b32.xlu0 %v3210_v60, %s2660_s8 }
  0xf7   : > { %v719_v17 = vpop.permute.xlu1 %718 }
  0xf8   : > { %796 = vst.msk [vmem:[#allocation2 + $0x98] sm:$0xff] %vm776_vm5, %v719_v17  ;;  %v717_v13 = vpop.permute.xlu0 %716 }
  0xf9   : > { %795 = vst.msk [vmem:[#allocation2 + $0x90] sm:$0xff] %vm776_vm5, %v717_v13  ;;  %1358 = vrot.lane.b32.xlu1 %v4340_v36, %s2662_s29 }
  0xfa   : > { %1225 = vrot.lane.b32.xlu0 %v2822_v24, %s2661_s19 }
  0xfb   : > { %v723_v33 = vpop.permute.xlu1 %722 }
  0xfc   : > { %798 = vst.msk [vmem:[#allocation2 + $0xa8] sm:$0xff] %vm776_vm5, %v723_v33  ;;  %v721_v56 = vpop.permute.xlu0 %720 }
  0xfd   : > { %797 = vst.msk [vmem:[#allocation2 + $0xa0] sm:$0xff] %vm776_vm5, %v721_v56  ;;  %962 = vrot.lane.b32.xlu1 %v4340_v36, %s2659_s7 }
  0xfe   : > { %829 = vrot.lane.b32.xlu0 %v2822_v24, %s2658_s6 }
  0xff   : > { %v727_v28 = vpop.permute.xlu1 %726 }
 0x100   : > { %800 = vst.msk [vmem:[#allocation2 + $0xb8] sm:$0xff] %vm776_vm5, %v727_v28  ;;  %v725_v60 = vpop.permute.xlu0 %724 }
 0x101   : > { %799 = vst.msk [vmem:[#allocation2 + $0xb0] sm:$0xff] %vm776_vm5, %v725_v60  ;;  %1492 = vrot.lane.b32.xlu1 %v3228_v54, %s2663_s9  ;;  %v4347_v60 = vld [vmem:[#allocation6_spill] sm:$0xff] }
 0x102   : > { %1360 = vrot.lane.b32.xlu0 %v4341_v3, %s2662_s29 }
 0x103   : > { %v731_v15 = vpop.permute.xlu1 %730 }
 0x104   : > { %802 = vst.msk [vmem:[#allocation2 + $0xc8] sm:$0xff] %vm776_vm5, %v731_v15  ;;  %v729_v18 = vpop.permute.xlu0 %728 }
 0x105   : > { %801 = vst.msk [vmem:[#allocation2 + $0xc0] sm:$0xff] %vm776_vm5, %v729_v18  ;;  %1096 = vrot.lane.b32.xlu1 %v3228_v54, %s2660_s8 }
 0x106   : > { %964 = vrot.lane.b32.xlu0 %v4341_v3, %s2659_s7 }
 0x107   : > { %v735_v24 = vpop.permute.xlu1 %734 }
 0x108   : > { %804 = vst.msk [vmem:[#allocation2 + $0xd8] sm:$0xff] %vm776_vm5, %v735_v24  ;;  %v733_v49 = vpop.permute.xlu0 %732 }
 0x109   : > { %803 = vst.msk [vmem:[#allocation2 + $0xd0] sm:$0xff] %vm776_vm5, %v733_v49  ;;  %1098 = vrot.lane.b32.xlu1 %v3223_v14, %s2660_s8  ;;  %v4348_v49 = vld [vmem:[#allocation23_spill] sm:$0xff] }
 0x10a   : > { %1494 = vrot.lane.b32.xlu0 %v3223_v14, %s2663_s9  ;;  %v4342_v14 = vld [vmem:[#allocation20_spill] sm:$0xff] }
 0x10b   : > { %v739_v53 = vpop.permute.xlu1 %738 }
 0x10c   : > { %806 = vst.msk [vmem:[#allocation2 + $0xe8] sm:$0xff] %vm776_vm5, %v739_v53  ;;  %v737_v20 = vpop.permute.xlu0 %736 }
 0x10d   : > { %805 = vst.msk [vmem:[#allocation2 + $0xe0] sm:$0xff] %vm776_vm5, %v737_v20  ;;  %831 = vrot.lane.b32.xlu1 %v2844_v30, %s2658_s6 }
 0x10e   : > { %1227 = vrot.lane.b32.xlu0 %v2844_v30, %s2661_s19 }
 0x10f   : > { %v743_v54 = vpop.permute.xlu1 %742 }
 0x110   : > { %808 = vst.msk [vmem:[#allocation2 + $0xf8] sm:$0xff] %vm776_vm5, %v743_v54  ;;  %v741_v16 = vpop.permute.xlu0 %740 }
 0x111   : > { %807 = vst.msk [vmem:[#allocation2 + $0xf0] sm:$0xff] %vm776_vm5, %v741_v16  ;;  %1362 = vrot.lane.b32.xlu1 %v4342_v14, %s2662_s29 }
 0x112   : > { %1229 = vrot.lane.b32.xlu0 %v2841_v29, %s2661_s19 }
 0x113   : > { %v814_v0 = vpop.permute.xlu1 %813 }
 0x114   : > { %909 = vst.msk [vmem:[#allocation2 + $0x8] sm:$0xff] %vm907_vm6, %v814_v0  ;;  %v812_v52 = vpop.permute.xlu0 %811 }
 0x115   : > { %908 = vst.msk [vmem:[#allocation2] sm:$0xff] %vm907_vm6, %v812_v52  ;;  %966 = vrot.lane.b32.xlu1 %v4342_v14, %s2659_s7 }
 0x116   : > { %833 = vrot.lane.b32.xlu0 %v2841_v29, %s2658_s6 }
 0x117   : > { %v818_v30 = vpop.permute.xlu1 %817 }
 0x118   : > { %911 = vst.msk [vmem:[#allocation2 + $0x18] sm:$0xff] %vm907_vm6, %v818_v30  ;;  %v816_v1 = vpop.permute.xlu0 %815 }
 0x119   : > { %910 = vst.msk [vmem:[#allocation2 + $0x10] sm:$0xff] %vm907_vm6, %v816_v1  ;;  %1496 = vrot.lane.b32.xlu1 %v3241_v6, %s2663_s9  ;;  %v4349_v1 = vld [vmem:[#allocation26_spill] sm:$0xff] }
 0x11a   : > { %1364 = vrot.lane.b32.xlu0 %v4343_v34, %s2662_s29 }
 0x11b   : > { %v822_v12 = vpop.permute.xlu1 %821 }
 0x11c   : > { %913 = vst.msk [vmem:[#allocation2 + $0x28] sm:$0xff] %vm907_vm6, %v822_v12  ;;  %v820_v27 = vpop.permute.xlu0 %819 }
 0x11d   : > { %912 = vst.msk [vmem:[#allocation2 + $0x20] sm:$0xff] %vm907_vm6, %v820_v27  ;;  %1100 = vrot.lane.b32.xlu1 %v3241_v6, %s2660_s8 }
 0x11e   : > { %968 = vrot.lane.b32.xlu0 %v4343_v34, %s2659_s7  ;;  %v4350_v34 = vld [vmem:[#allocation7_spill] sm:$0xff] }
 0x11f   : > { %v826_v29 = vpop.permute.xlu1 %825 }
 0x120   : > { %915 = vst.msk [vmem:[#allocation2 + $0x38] sm:$0xff] %vm907_vm6, %v826_v29  ;;  %v824_v2 = vpop.permute.xlu0 %823 }
 0x121   : > { %914 = vst.msk [vmem:[#allocation2 + $0x30] sm:$0xff] %vm907_vm6, %v824_v2  ;;  %1102 = vrot.lane.b32.xlu1 %v3236_v39, %s2660_s8  ;;  %v4351_v2 = vld [vmem:[#allocation25_spill] sm:$0xff] }
 0x122   : > { %1498 = vrot.lane.b32.xlu0 %v3236_v39, %s2663_s9  ;;  %v4344_v39 = vld [vmem:[#allocation22_spill] sm:$0xff] }
 0x123   : > { %v947_v37 = vpop.permute.xlu1 %946 }
 0x124   : > { %1043 = vst.msk [vmem:[#allocation2] sm:$0xff] %vm1042_vm7, %v947_v37  ;;  %v828_v6 = vpop.permute.xlu0 %827 }
 0x125   : > { %916 = vst.msk [vmem:[#allocation2 + $0x40] sm:$0xff] %vm907_vm6, %v828_v6  ;;  %835 = vrot.lane.b32.xlu1 %v2854_v32, %s2658_s6 }
 0x126   : > { %1231 = vrot.lane.b32.xlu0 %v2854_v32, %s2661_s19 }
 0x127   : > { %v1081_v23 = vpop.permute.xlu1 %1080 }
 0x128   : > { %1177 = vst.msk [vmem:[#allocation2] sm:$0xff] %vm1176_vm8, %v1081_v23  ;;  %v949_v5 = vpop.permute.xlu0 %948 }
 0x129   : > { %1044 = vst.msk [vmem:[#allocation2 + $0x8] sm:$0xff] %vm1042_vm7, %v949_v5  ;;  %1366 = vrot.lane.b32.xlu1 %v4344_v39, %s2662_s29 }
 0x12a   : > { %1233 = vrot.lane.b32.xlu0 %v2851_v31, %s2661_s19 }
 0x12b   : > { %v1212_v11 = vpop.permute.xlu1 %1211 }
 0x12c   : > { %1308 = vst.msk [vmem:[#allocation2] sm:$0xff] %vm1307_vm9, %v1212_v11  ;;  %v1083_v19 = vpop.permute.xlu0 %1082 }
 0x12d   : > { %1178 = vst.msk [vmem:[#allocation2 + $0x8] sm:$0xff] %vm1176_vm8, %v1083_v19  ;;  %970 = vrot.lane.b32.xlu1 %v4344_v39, %s2659_s7 }
 0x12e   : > { %837 = vrot.lane.b32.xlu0 %v2851_v31, %s2658_s6 }
 0x12f   : > { %v1347_v32 = vpop.permute.xlu1 %1346 }
 0x130   : > { %1443 = vst.msk [vmem:[#allocation2] sm:$0xff] %vm1442_vm10, %v1347_v32  ;;  %v1214_v43 = vpop.permute.xlu0 %1213 }
 0x131   : > { %1309 = vst.msk [vmem:[#allocation2 + $0x8] sm:$0xff] %vm1307_vm9, %v1214_v43  ;;  %1500 = vrot.lane.b32.xlu1 %v3254_v22, %s2663_s9 }
 0x132   : > { %1368 = vrot.lane.b32.xlu0 %v4345_v59, %s2662_s29 }
 0x133   : > { %v1349_v38 = vpop.permute.xlu1 %1348 }
 0x134   : > { %1444 = vst.msk [vmem:[#allocation2 + $0x8] sm:$0xff] %vm1442_vm10, %v1349_v38  ;;  %v951_v17 = vpop.permute.xlu0 %950 }
 0x135   : > { %1045 = vst.msk [vmem:[#allocation2 + $0x10] sm:$0xff] %vm1042_vm7, %v951_v17  ;;  %1104 = vrot.lane.b32.xlu1 %v3254_v22, %s2660_s8 }
 0x136   : > { %972 = vrot.lane.b32.xlu0 %v4345_v59, %s2659_s7  ;;  %v4353_v59 = vld [vmem:[#allocation8_spill] sm:$0xff] }
 0x137   : > { %v953_v31 = vpop.permute.xlu1 %952 }
 0x138   : > { %1046 = vst.msk [vmem:[#allocation2 + $0x18] sm:$0xff] %vm1042_vm7, %v953_v31  ;;  %v1481_v13 = vpop.permute.xlu0 %1480 }
 0x139   : > { %1577 = vst.msk [vmem:[#allocation2] sm:$0xff] %vm1576_vm11, %v1481_v13  ;;  %1106 = vrot.lane.b32.xlu1 %v3249_v61, %s2660_s8  ;;  %v4354_v13 = vld [vmem:[#allocation27_spill] sm:$0xff] }
 0x13a   : > { %1502 = vrot.lane.b32.xlu0 %v3249_v61, %s2663_s9  ;;  %v4346_v61 = vld [vmem:[#allocation24_spill] sm:$0xff] }
 0x13b   : > { %v1483_v36 = vpop.permute.xlu1 %1482 }
 0x13c   : > { %1578 = vst.msk [vmem:[#allocation2 + $0x8] sm:$0xff] %vm1576_vm11, %v1483_v36  ;;  %v1085_v22 = vpop.permute.xlu0 %1084 }
 0x13d   : > { %1179 = vst.msk [vmem:[#allocation2 + $0x10] sm:$0xff] %vm1176_vm8, %v1085_v22  ;;  %839 = vrot.lane.b32.xlu1 %v2881_v40, %s2658_s6 }
 0x13e   : > { %1235 = vrot.lane.b32.xlu0 %v2881_v40, %s2661_s19 }
 0x13f   : > { %v1216_v33 = vpop.permute.xlu1 %1215 }
 0x140   : > { %1310 = vst.msk [vmem:[#allocation2 + $0x10] sm:$0xff] %vm1307_vm9, %v1216_v33  ;;  %v1087_v56 = vpop.permute.xlu0 %1086  ;;  %v1609_v28 = vld [vmem:[#allocation2] sm:$0xff] }
 0x141   : > { %1180 = vst.msk [vmem:[#allocation2 + $0x18] sm:$0xff] %vm1176_vm8, %v1087_v56  ;;  %2450 = vmatprep.mubr.msk.f32.mxu0 %vm1646_vm12, %v1609_v28  ;;  %1370 = vrot.lane.b32.xlu1 %v4346_v61, %s2662_s29 }
 0x142   : > { %1237 = vrot.lane.b32.xlu0 %v4347_v60, %s2661_s19 }
 0x143   : > { %v1351_v3 = vpop.permute.xlu1 %1350  ;;  %v1610_v15 = vld [vmem:[#allocation2 + $0x8] sm:$0xff] }
 0x144   : > { %1445 = vst.msk [vmem:[#allocation2 + $0x10] sm:$0xff] %vm1442_vm10, %v1351_v3  ;;  %v1218_v40 = vpop.permute.xlu0 %1217  ;;  %2451 = vmatmul.mubr.msk.f32.vlgmr.msra.gmra.mrb[0].mxu0 %vm1646_vm12, %v1610_v15 }
 0x145   : > { %1311 = vst.msk [vmem:[#allocation2 + $0x18] sm:$0xff] %vm1307_vm9, %v1218_v40  ;;  %974 = vrot.lane.b32.xlu1 %v4346_v61, %s2659_s7  ;;  %v4356_v40 = vld [vmem:[#allocation9_spill] sm:$0xff] }
 0x146   : > { %841 = vrot.lane.b32.xlu0 %v4347_v60, %s2658_s6 }
 0x147   : > { %v1353_v18 = vpop.permute.xlu1 %1352 }
 0x148   : > { %1446 = vst.msk [vmem:[#allocation2 + $0x18] sm:$0xff] %vm1442_vm10, %v1353_v18  ;;  %v955_v24 = vpop.permute.xlu0 %954 }
 0x149   : > { %1047 = vst.msk [vmem:[#allocation2 + $0x20] sm:$0xff] %vm1042_vm7, %v955_v24  ;;  %1504 = vrot.lane.b32.xlu1 %v3267_v48, %s2663_s9 }
 0x14a   : > { %1372 = vrot.lane.b32.xlu0 %v4348_v49, %s2662_s29 }
 0x14b   : > { %v957_v53 = vpop.permute.xlu1 %956 }
 0x14c   : > { %1048 = vst.msk [vmem:[#allocation2 + $0x28] sm:$0xff] %vm1042_vm7, %v957_v53  ;;  %v1485_v20 = vpop.permute.xlu0 %1484  ;;  %v4357_v53 = vld [vmem:[#allocation29_spill] sm:$0xff] }
 0x14d   : > { %1579 = vst.msk [vmem:[#allocation2 + $0x10] sm:$0xff] %vm1576_vm11, %v1485_v20  ;;  %1108 = vrot.lane.b32.xlu1 %v3267_v48, %s2660_s8 }
 0x14e   : > { %976 = vrot.lane.b32.xlu0 %v4348_v49, %s2659_s7 }
 0x14f   : > { %v1487_v54 = vpop.permute.xlu1 %1486 }
 0x150   : > { %1580 = vst.msk [vmem:[#allocation2 + $0x18] sm:$0xff] %vm1576_vm11, %v1487_v54  ;;  %v1089_v16 = vpop.permute.xlu0 %1088 }
 0x151   : > { %1181 = vst.msk [vmem:[#allocation2 + $0x20] sm:$0xff] %vm1176_vm8, %v1089_v16  ;;  %1110 = vrot.lane.b32.xlu1 %v3262_v10, %s2660_s8 }
 0x152   : > { %1506 = vrot.lane.b32.xlu0 %v3262_v10, %s2663_s9 }
 0x153   : > { %v1220_v14 = vpop.permute.xlu1 %1219 }
 0x154   : > { %1312 = vst.msk [vmem:[#allocation2 + $0x20] sm:$0xff] %vm1307_vm9, %v1220_v14  ;;  %v1091_v0 = vpop.permute.xlu0 %1090  ;;  %v1611_v48 = vld [vmem:[#allocation2 + $0x10] sm:$0xff] }
 0x155   : > { %1182 = vst.msk [vmem:[#allocation2 + $0x28] sm:$0xff] %vm1176_vm8, %v1091_v0  ;;  %2453 = vmatprep.mubr.msk.f32.mxu0 %vm1646_vm12, %v1611_v48  ;;  %843 = vrot.lane.b32.xlu1 %v2887_v42, %s2658_s6 }
 0x156   : > { %1239 = vrot.lane.b32.xlu0 %v2887_v42, %s2661_s19 }
 0x157   : > { %v1355_v52 = vpop.permute.xlu1 %1354  ;;  %v1612_v30 = vld [vmem:[#allocation2 + $0x18] sm:$0xff] }
 0x158   : > { %1447 = vst.msk [vmem:[#allocation2 + $0x20] sm:$0xff] %vm1442_vm10, %v1355_v52  ;;  %v1222_v10 = vpop.permute.xlu0 %1221  ;;  %2454 = vmatmul.mubr.msk.f32.gmra.mrb[2].mxu0 %vm1646_vm12, %v1612_v30 }
 0x159   : > { %1313 = vst.msk [vmem:[#allocation2 + $0x28] sm:$0xff] %vm1307_vm9, %v1222_v10  ;;  %1374 = vrot.lane.b32.xlu1 %v4349_v1, %s2662_s29 }
 0x15a   : > { %1241 = vrot.lane.b32.xlu0 %v4350_v34, %s2661_s19 }
 0x15b   : > { %v1357_v12 = vpop.permute.xlu1 %1356 }
 0x15c   : > { %1448 = vst.msk [vmem:[#allocation2 + $0x28] sm:$0xff] %vm1442_vm10, %v1357_v12  ;;  %v959_v27 = vpop.permute.xlu0 %958 }
 0x15d   : > { %1049 = vst.msk [vmem:[#allocation2 + $0x30] sm:$0xff] %vm1042_vm7, %v959_v27  ;;  %978 = vrot.lane.b32.xlu1 %v4349_v1, %s2659_s7  ;;  %v4359_v1 = vld [vmem:[#allocation11_spill] sm:$0xff] }
 0x15e   : > { %845 = vrot.lane.b32.xlu0 %v4350_v34, %s2658_s6 }
 0x15f   : > { %v961_v42 = vpop.permute.xlu1 %960 }
 0x160   : > { %1050 = vst.msk [vmem:[#allocation2 + $0x38] sm:$0xff] %vm1042_vm7, %v961_v42  ;;  %v1489_v29 = vpop.permute.xlu0 %1488  ;;  %v4360_v42 = vld [vmem:[#allocation31_spill] sm:$0xff] }
 0x161   : > { %1581 = vst.msk [vmem:[#allocation2 + $0x20] sm:$0xff] %vm1576_vm11, %v1489_v29  ;;  %1508 = vrot.lane.b32.xlu1 %v3280_v9, %s2663_s9 }
 0x162   : > { %1376 = vrot.lane.b32.xlu0 %v4351_v2, %s2662_s29 }
 0x163   : > { %v1491_v37 = vpop.permute.xlu1 %1490 }
 0x164   : > { %1582 = vst.msk [vmem:[#allocation2 + $0x28] sm:$0xff] %vm1576_vm11, %v1491_v37  ;;  %v1093_v6 = vpop.permute.xlu0 %1092 }
 0x165   : > { %1183 = vst.msk [vmem:[#allocation2 + $0x30] sm:$0xff] %vm1176_vm8, %v1093_v6  ;;  %1112 = vrot.lane.b32.xlu1 %v3280_v9, %s2660_s8 }
 0x166   : > { %980 = vrot.lane.b32.xlu0 %v4351_v2, %s2659_s7 }
 0x167   : > { %v1224_v23 = vpop.permute.xlu1 %1223 }
 0x168   : > { %v1095_v5 = vpop.permute.xlu0 %1094  ;;  %1314 = vst.msk [vmem:[#allocation2 + $0x30] sm:$0xff] %vm1307_vm9, %v1224_v23  ;;  %v1613_v39 = vld [vmem:[#allocation2 + $0x20] sm:$0xff] }
 0x169   : > { %1184 = vst.msk [vmem:[#allocation2 + $0x38] sm:$0xff] %vm1176_vm8, %v1095_v5  ;;  %2456 = vmatprep.mubr.msk.f32.mxu0 %vm1646_vm12, %v1613_v39  ;;  %1114 = vrot.lane.b32.xlu1 %v3275_v7, %s2660_s8 }
 0x16a   : > { %1510 = vrot.lane.b32.xlu0 %v3275_v7, %s2663_s9  ;;  %v4352_v7 = vld [vmem:[#allocation28_spill] sm:$0xff] }
 0x16b   : > { %v1359_v11 = vpop.permute.xlu1 %1358  ;;  %v1614_v9 = vld [vmem:[#allocation2 + $0x28] sm:$0xff] }
 0x16c   : > { %v1226_v19 = vpop.permute.xlu0 %1225  ;;  %1449 = vst.msk [vmem:[#allocation2 + $0x30] sm:$0xff] %vm1442_vm10, %v1359_v11  ;;  %2457 = vmatmul.mubr.msk.f32.gmra.mrb[4].mxu0 %vm1646_vm12, %v1614_v9  ;;  %v4361_v11 = vld [vmem:[#allocation13_spill] sm:$0xff] }
 0x16d   : > { %1315 = vst.msk [vmem:[#allocation2 + $0x38] sm:$0xff] %vm1307_vm9, %v1226_v19  ;;  %847 = vrot.lane.b32.xlu1 %v2895_v44, %s2658_s6 }
 0x16e   : > { %1243 = vrot.lane.b32.xlu0 %v2895_v44, %s2661_s19 }
 0x16f   : > { %v963_v32 = vpop.permute.xlu1 %962 }
 0x170   : > { %v830_v43 = vpop.permute.xlu0 %829  ;;  %1051 = vst.msk [vmem:[#allocation2 + $0x40] sm:$0xff] %vm1042_vm7, %v963_v32  ;;  %v4363_v32 = vld [vmem:[#allocation12_spill] sm:$0xff] }
 0x171   : > { %917 = vst.msk [vmem:[#allocation2 + $0x48] sm:$0xff] %vm907_vm6, %v830_v43  ;;  %1378 = vrot.lane.b32.xlu1 %v4352_v7, %s2662_s29 }
 0x172   : > { %1245 = vrot.lane.b32.xlu0 %v4353_v59, %s2661_s19 }
 0x173   : > { %v1493_v38 = vpop.permute.xlu1 %1492 }
 0x174   : > { %v1361_v17 = vpop.permute.xlu0 %1360  ;;  %1583 = vst.msk [vmem:[#allocation2 + $0x30] sm:$0xff] %vm1576_vm11, %v1493_v38 }
 0x175   : > { %1450 = vst.msk [vmem:[#allocation2 + $0x38] sm:$0xff] %vm1442_vm10, %v1361_v17  ;;  %982 = vrot.lane.b32.xlu1 %v4352_v7, %s2659_s7  ;;  %v4364_v17 = vld [vmem:[#allocation33_spill] sm:$0xff] }
 0x176   : > { %849 = vrot.lane.b32.xlu0 %v4353_v59, %s2658_s6 }
 0x177   : > { %v1097_v44 = vpop.permute.xlu1 %1096 }
 0x178   : > { %v965_v31 = vpop.permute.xlu0 %964  ;;  %1185 = vst.msk [vmem:[#allocation2 + $0x40] sm:$0xff] %vm1176_vm8, %v1097_v44 }
 0x179   : > { %1052 = vst.msk [vmem:[#allocation2 + $0x48] sm:$0xff] %vm1042_vm7, %v965_v31  ;;  %1512 = vrot.lane.b32.xlu1 %v3293_v25, %s2663_s9 }
 0x17a   : > { %1380 = vrot.lane.b32.xlu0 %v4354_v13, %s2662_s29 }
 0x17b   : > { %v1099_v36 = vpop.permute.xlu1 %1098  ;;  %v1615_v22 = vld [vmem:[#allocation2 + $0x30] sm:$0xff] }
 0x17c   : > { %v1495_v33 = vpop.permute.xlu0 %1494  ;;  %1186 = vst.msk [vmem:[#allocation2 + $0x48] sm:$0xff] %vm1176_vm8, %v1099_v36  ;;  %2459 = vmatprep.mubr.msk.f32.mxu0 %vm1646_vm12, %v1615_v22 }
 0x17d   : > { %1584 = vst.msk [vmem:[#allocation2 + $0x38] sm:$0xff] %vm1576_vm11, %v1495_v33  ;;  %1116 = vrot.lane.b32.xlu1 %v3293_v25, %s2660_s8 }
 0x17e   : > { %984 = vrot.lane.b32.xlu0 %v4354_v13, %s2659_s7 }
 0x17f   : > { %v832_v56 = vpop.permute.xlu1 %831 }
 0x180   : > { %v1228_v28 = vpop.permute.xlu0 %1227  ;;  %918 = vst.msk [vmem:[#allocation2 + $0x50] sm:$0xff] %vm907_vm6, %v832_v56 }
 0x181   : > { %1316 = vst.msk [vmem:[#allocation2 + $0x40] sm:$0xff] %vm1307_vm9, %v1228_v28  ;;  %1118 = vrot.lane.b32.xlu1 %v3288_v26, %s2660_s8 }
 0x182   : > { %1514 = vrot.lane.b32.xlu0 %v3288_v26, %s2663_s9  ;;  %v4355_v26 = vld [vmem:[#allocation30_spill] sm:$0xff] }
 0x183   : > { %v1363_v61 = vpop.permute.xlu1 %1362 }
 0x184   : > { %v1230_v60 = vpop.permute.xlu0 %1229  ;;  %1451 = vst.msk [vmem:[#allocation2 + $0x40] sm:$0xff] %vm1442_vm10, %v1363_v61  ;;  %v1616_v25 = vld [vmem:[#allocation2 + $0x38] sm:$0xff] }
 0x185   : > { %1317 = vst.msk [vmem:[#allocation2 + $0x48] sm:$0xff] %vm1307_vm9, %v1230_v60  ;;  %2460 = vmatmul.mubr.msk.f32.gmra.mrb[6].mxu0 %vm1646_vm12, %v1616_v25  ;;  %851 = vrot.lane.b32.xlu1 %v2909_v46, %s2658_s6  ;;  %v4366_v60 = vld [vmem:[#allocation14_spill] sm:$0xff] }
 0x186   : > { %1247 = vrot.lane.b32.xlu0 %v2909_v46, %s2661_s19 }
 0x187   : > { %v967_v3 = vpop.permute.xlu1 %966 }
 0x188   : > { %v834_v15 = vpop.permute.xlu0 %833  ;;  %1053 = vst.msk [vmem:[#allocation2 + $0x50] sm:$0xff] %vm1042_vm7, %v967_v3 }
 0x189   : > { %919 = vst.msk [vmem:[#allocation2 + $0x58] sm:$0xff] %vm907_vm6, %v834_v15  ;;  %1382 = vrot.lane.b32.xlu1 %v4355_v26, %s2662_s29 }
 0x18a   : > { %1249 = vrot.lane.b32.xlu0 %v4356_v40, %s2661_s19 }
 0x18b   : > { %v1497_v18 = vpop.permute.xlu1 %1496 }
 0x18c   : > { %v1365_v24 = vpop.permute.xlu0 %1364  ;;  %1585 = vst.msk [vmem:[#allocation2 + $0x40] sm:$0xff] %vm1576_vm11, %v1497_v18 }
 0x18d   : > { %1452 = vst.msk [vmem:[#allocation2 + $0x48] sm:$0xff] %vm1442_vm10, %v1365_v24  ;;  %986 = vrot.lane.b32.xlu1 %v4355_v26, %s2659_s7  ;;  %v4367_v26 = vld [vmem:[#allocation35_spill] sm:$0xff] }
 0x18e   : > { %853 = vrot.lane.b32.xlu0 %v4356_v40, %s2658_s6 }
 0x18f   : > { %v1101_v46 = vpop.permute.xlu1 %1100 }
 0x190   : > { %v969_v49 = vpop.permute.xlu0 %968  ;;  %1187 = vst.msk [vmem:[#allocation2 + $0x50] sm:$0xff] %vm1176_vm8, %v1101_v46 }
 0x191   : > { %1054 = vst.msk [vmem:[#allocation2 + $0x58] sm:$0xff] %vm1042_vm7, %v969_v49  ;;  %1516 = vrot.lane.b32.xlu1 %v3306_v35, %s2663_s9 }
 0x192   : > { %1384 = vrot.lane.b32.xlu0 %v4357_v53, %s2662_s29 }
 0x193   : > { %v1103_v20 = vpop.permute.xlu1 %1102  ;;  %v1617_v54 = vld [vmem:[#allocation2 + $0x40] sm:$0xff] }
 0x194   : > { %v1499_v16 = vpop.permute.xlu0 %1498  ;;  %1188 = vst.msk [vmem:[#allocation2 + $0x58] sm:$0xff] %vm1176_vm8, %v1103_v20  ;;  %2462 = vmatprep.mubr.msk.f32.mxu0 %vm1646_vm12, %v1617_v54 }
 0x195   : > { %1586 = vst.msk [vmem:[#allocation2 + $0x48] sm:$0xff] %vm1576_vm11, %v1499_v16  ;;  %1120 = vrot.lane.b32.xlu1 %v3306_v35, %s2660_s8 }
 0x196   : > { %988 = vrot.lane.b32.xlu0 %v4357_v53, %s2659_s7 }
 0x197   : > { %v836_v14 = vpop.permute.xlu1 %835 }
 0x198   : > { %v1232_v0 = vpop.permute.xlu0 %1231  ;;  %920 = vst.msk [vmem:[#allocation2 + $0x60] sm:$0xff] %vm907_vm6, %v836_v14 }
 0x199   : > { %1318 = vst.msk [vmem:[#allocation2 + $0x50] sm:$0xff] %vm1307_vm9, %v1232_v0  ;;  %1122 = vrot.lane.b32.xlu1 %v3301_v4, %s2660_s8 }
 0x19a   : > { %1518 = vrot.lane.b32.xlu0 %v3301_v4, %s2663_s9  ;;  %v4358_v4 = vld [vmem:[#allocation32_spill] sm:$0xff] }
 0x19b   : > { %v1367_v48 = vpop.permute.xlu1 %1366 }
 0x19c   : > { %v1234_v52 = vpop.permute.xlu0 %1233  ;;  %1453 = vst.msk [vmem:[#allocation2 + $0x50] sm:$0xff] %vm1442_vm10, %v1367_v48  ;;  %v1618_v35 = vld [vmem:[#allocation2 + $0x48] sm:$0xff] }
 0x19d   : > { %1319 = vst.msk [vmem:[#allocation2 + $0x58] sm:$0xff] %vm1307_vm9, %v1234_v52  ;;  %2463 = vmatmul.mubr.msk.f32.gmra.mrb[8].mxu0 %vm1646_vm12, %v1618_v35  ;;  %855 = vrot.lane.b32.xlu1 %v2926_v51, %s2658_s6  ;;  %v4369_v52 = vld [vmem:[#allocation37_spill] sm:$0xff] }
 0x19e   : > { %1251 = vrot.lane.b32.xlu0 %v2926_v51, %s2661_s19 }
 0x19f   : > { %v971_v30 = vpop.permute.xlu1 %970 }
 0x1a0   : > { %v838_v10 = vpop.permute.xlu0 %837  ;;  %1055 = vst.msk [vmem:[#allocation2 + $0x60] sm:$0xff] %vm1042_vm7, %v971_v30 }
 0x1a1   : > { %921 = vst.msk [vmem:[#allocation2 + $0x68] sm:$0xff] %vm907_vm6, %v838_v10  ;;  %1386 = vrot.lane.b32.xlu1 %v4358_v4, %s2662_s29 }
 0x1a2   : > { %1253 = vrot.lane.b32.xlu0 %v4359_v1, %s2661_s19 }
 0x1a3   : > { %v1501_v34 = vpop.permute.xlu1 %1500 }
 0x1a4   : > { %v1369_v12 = vpop.permute.xlu0 %1368  ;;  %1587 = vst.msk [vmem:[#allocation2 + $0x50] sm:$0xff] %vm1576_vm11, %v1501_v34  ;;  %v302_v34 = vld [vmem:[%s2748_s30 + $0x180] sm:$0xff] }
 0x1a5   : > { %1454 = vst.msk [vmem:[#allocation2 + $0x58] sm:$0xff] %vm1442_vm10, %v1369_v12  ;;  %990 = vrot.lane.b32.xlu1 %v4358_v4, %s2659_s7  ;;  %v303_v4 = vld [vmem:[%s2748_s30 + $0x188] sm:$0xff]  ;;  %v941_v12 = vrot.slane %v302_v34, 1 }
 0x1a6   : > { %857 = vrot.lane.b32.xlu0 %v4359_v1, %s2658_s6 }
 0x1a7   : > { %v1105_v51 = vpop.permute.xlu1 %1104 }
 0x1a8   : > { %v973_v27 = vpop.permute.xlu0 %972  ;;  %1189 = vst.msk [vmem:[#allocation2 + $0x60] sm:$0xff] %vm1176_vm8, %v1105_v51 }
 0x1a9   : > { %1056 = vst.msk [vmem:[#allocation2 + $0x68] sm:$0xff] %vm1042_vm7, %v973_v27  ;;  %1520 = vrot.lane.b32.xlu1 %v3319_v8, %s2663_s9 }
 0x1aa   : > { %1388 = vrot.lane.b32.xlu0 %v4360_v42, %s2662_s29 }
 0x1ab   : > { %v1107_v29 = vpop.permute.xlu1 %1106  ;;  %v1619_v2 = vld [vmem:[#allocation2 + $0x50] sm:$0xff] }
 0x1ac   : > { %v1503_v37 = vpop.permute.xlu0 %1502  ;;  %1190 = vst.msk [vmem:[#allocation2 + $0x68] sm:$0xff] %vm1176_vm8, %v1107_v29  ;;  %2465 = vmatprep.mubr.msk.f32.mxu0 %vm1646_vm12, %v1619_v2 }
 0x1ad   : > { %1588 = vst.msk [vmem:[#allocation2 + $0x58] sm:$0xff] %vm1576_vm11, %v1503_v37  ;;  %1124 = vrot.lane.b32.xlu1 %v3319_v8, %s2660_s8 }
 0x1ae   : > { %992 = vrot.lane.b32.xlu0 %v4360_v42, %s2659_s7 }
 0x1af   : > { %v840_v6 = vpop.permute.xlu1 %839 }
 0x1b0   : > { %v1236_v23 = vpop.permute.xlu0 %1235  ;;  %922 = vst.msk [vmem:[#allocation2 + $0x70] sm:$0xff] %vm907_vm6, %v840_v6  ;;  %v1075_v6 = vrot.slane %v302_v34, 2 }
 0x1b1   : > { %1320 = vst.msk [vmem:[#allocation2 + $0x60] sm:$0xff] %vm1307_vm9, %v1236_v23  ;;  %1126 = vrot.lane.b32.xlu1 %v3314_v47, %s2660_s8  ;;  %v1076_v23 = vrot.slane %v303_v4, 2 }
 0x1b2   : > { %1522 = vrot.lane.b32.xlu0 %v3314_v47, %s2663_s9  ;;  %v4362_v47 = vld [vmem:[#allocation34_spill] sm:$0xff] }
 0x1b3   : > { %v1371_v5 = vpop.permute.xlu1 %1370 }
 0x1b4   : > { %v1238_v39 = vpop.permute.xlu0 %1237  ;;  %1455 = vst.msk [vmem:[#allocation2 + $0x60] sm:$0xff] %vm1442_vm10, %v1371_v5  ;;  %v1620_v8 = vld [vmem:[#allocation2 + $0x58] sm:$0xff] }
 0x1b5   : > { %1321 = vst.msk [vmem:[#allocation2 + $0x68] sm:$0xff] %vm1307_vm9, %v1238_v39  ;;  %2466 = vmatmul.mubr.msk.f32.gmra.mrb[10].mxu0 %vm1646_vm12, %v1620_v8  ;;  %859 = vrot.lane.b32.xlu1 %v4361_v11, %s2658_s6 }
 0x1b6   : > { %1255 = vrot.lane.b32.xlu0 %v4361_v11, %s2661_s19  ;;  %v1077_v11 = vsel %vm599_vm2, %v1075_v6, %v1076_v23 }
 0x1b7   : > { %v975_v9 = vpop.permute.xlu1 %974 }
 0x1b8   : > { %v842_v19 = vpop.permute.xlu0 %841  ;;  %1057 = vst.msk [vmem:[#allocation2 + $0x70] sm:$0xff] %vm1042_vm7, %v975_v9 }
 0x1b9   : > { %923 = vst.msk [vmem:[#allocation2 + $0x78] sm:$0xff] %vm907_vm6, %v842_v19  ;;  %1390 = vrot.lane.b32.xlu1 %v4362_v47, %s2662_s29 }
 0x1ba   : > { %1257 = vrot.lane.b32.xlu0 %v4363_v32, %s2661_s19 }
 0x1bb   : > { %v1505_v43 = vpop.permute.xlu1 %1504 }
 0x1bc   : > { %v1373_v7 = vpop.permute.xlu0 %1372  ;;  %1589 = vst.msk [vmem:[#allocation2 + $0x60] sm:$0xff] %vm1576_vm11, %v1505_v43 }
 0x1bd   : > { %1456 = vst.msk [vmem:[#allocation2 + $0x68] sm:$0xff] %vm1442_vm10, %v1373_v7  ;;  %994 = vrot.lane.b32.xlu1 %v4362_v47, %s2659_s7 }
 0x1be   : > { %861 = vrot.lane.b32.xlu0 %v4363_v32, %s2658_s6 }
 0x1bf   : > { %v1109_v59 = vpop.permute.xlu1 %1108 }
 0x1c0   : > { %v977_v38 = vpop.permute.xlu0 %976  ;;  %1191 = vst.msk [vmem:[#allocation2 + $0x70] sm:$0xff] %vm1176_vm8, %v1109_v59 }
 0x1c1   : > { %1058 = vst.msk [vmem:[#allocation2 + $0x78] sm:$0xff] %vm1042_vm7, %v977_v38  ;;  %1524 = vrot.lane.b32.xlu1 %v3332_v41, %s2663_s9 }
 0x1c2   : > { %1392 = vrot.lane.b32.xlu0 %v4364_v17, %s2662_s29 }
 0x1c3   : > { %v1111_v44 = vpop.permute.xlu1 %1110  ;;  %v1621_v31 = vld [vmem:[#allocation2 + $0x60] sm:$0xff] }
 0x1c4   : > { %v1507_v13 = vpop.permute.xlu0 %1506  ;;  %1192 = vst.msk [vmem:[#allocation2 + $0x78] sm:$0xff] %vm1176_vm8, %v1111_v44  ;;  %2468 = vmatprep.mubr.msk.f32.mxu0 %vm1646_vm12, %v1621_v31  ;;  %v306_v44 = vld [vmem:[%s2748_s30 + $0x1a0] sm:$0xff]  ;;  %v307_v31 = vld [vmem:[%s2748_s30 + $0x1a8] sm:$0x3] }
 0x1c5   : > { %1590 = vst.msk [vmem:[#allocation2 + $0x68] sm:$0xff] %vm1576_vm11, %v1507_v13  ;;  %1128 = vrot.lane.b32.xlu1 %v3332_v41, %s2660_s8 }
 0x1c6   : > { %996 = vrot.lane.b32.xlu0 %v4364_v17, %s2659_s7 }
 0x1c7   : > { %v844_v36 = vpop.permute.xlu1 %843 }
 0x1c8   : > { %v1240_v22 = vpop.permute.xlu0 %1239  ;;  %924 = vst.msk [vmem:[#allocation2 + $0x80] sm:$0xff] %vm907_vm6, %v844_v36  ;;  %v305_v36 = vld [vmem:[%s2748_s30 + $0x198] sm:$0xff] }
 0x1c9   : > { %1322 = vst.msk [vmem:[#allocation2 + $0x70] sm:$0xff] %vm1307_vm9, %v1240_v22  ;;  %1130 = vrot.lane.b32.xlu1 %v3327_v21, %s2660_s8  ;;  %v1342_v22 = vrot.slane %v306_v44, 1 }
 0x1ca   : > { %1526 = vrot.lane.b32.xlu0 %v3327_v21, %s2663_s9  ;;  %v4365_v21 = vld [vmem:[#allocation36_spill] sm:$0xff] }
 0x1cb   : > { %v1375_v33 = vpop.permute.xlu1 %1374 }
 0x1cc   : > { %v1242_v56 = vpop.permute.xlu0 %1241  ;;  %1457 = vst.msk [vmem:[#allocation2 + $0x70] sm:$0xff] %vm1442_vm10, %v1375_v33  ;;  %v1622_v41 = vld [vmem:[#allocation2 + $0x68] sm:$0xff]  ;;  %v1344_v33 = vrot.slane %v307_v31, 1 }
 0x1cd   : > { %1323 = vst.msk [vmem:[#allocation2 + $0x78] sm:$0xff] %vm1307_vm9, %v1242_v56  ;;  %2469 = vmatmul.mubr.msk.f32.gmra.mrb[12].mxu0 %vm1646_vm12, %v1622_v41  ;;  %863 = vrot.lane.b32.xlu1 %v2957_v58, %s2658_s6  ;;  %v1341_v41 = vrot.slane %v305_v36, 1 }
 0x1ce   : > { %1259 = vrot.lane.b32.xlu0 %v2957_v58, %s2661_s19 }
 0x1cf   : > { %v979_v28 = vpop.permute.xlu1 %978 }
 0x1d0   : > { %v846_v61 = vpop.permute.xlu0 %845  ;;  %1059 = vst.msk [vmem:[#allocation2 + $0x80] sm:$0xff] %vm1042_vm7, %v979_v28 }
 0x1d1   : > { %925 = vst.msk [vmem:[#allocation2 + $0x88] sm:$0xff] %vm907_vm6, %v846_v61  ;;  %1394 = vrot.lane.b32.xlu1 %v4365_v21, %s2662_s29 }
 0x1d2   : > { %1261 = vrot.lane.b32.xlu0 %v4366_v60, %s2661_s19 }
 0x1d3   : > { %v1509_v25 = vpop.permute.xlu1 %1508 }
 0x1d4   : > { %v1377_v3 = vpop.permute.xlu0 %1376  ;;  %1591 = vst.msk [vmem:[#allocation2 + $0x70] sm:$0xff] %vm1576_vm11, %v1509_v25  ;;  %v1478_v25 = vrot.slane %v307_v31, 2 }
 0x1d5   : > { %1458 = vst.msk [vmem:[#allocation2 + $0x78] sm:$0xff] %vm1442_vm10, %v1377_v3  ;;  %998 = vrot.lane.b32.xlu1 %v4365_v21, %s2659_s7  ;;  %v1476_v21 = vrot.slane %v306_v44, 2  ;;  %v1475_v3 = vrot.slane %v305_v36, 2 }
 0x1d6   : > { %865 = vrot.lane.b32.xlu0 %v4366_v60, %s2658_s6  ;;  %v1345_v60 = vsel %vm389_vm1, %v1342_v22, %v1344_v33 }
 0x1d7   : > { %v1113_v58 = vpop.permute.xlu1 %1112 }
 0x1d8   : > { %v981_v15 = vpop.permute.xlu0 %980  ;;  %1193 = vst.msk [vmem:[#allocation2 + $0x80] sm:$0xff] %vm1176_vm8, %v1113_v58 }
 0x1d9   : > { %1060 = vst.msk [vmem:[#allocation2 + $0x88] sm:$0xff] %vm1042_vm7, %v981_v15  ;;  %1528 = vrot.lane.b32.xlu1 %v3347_v57, %s2663_s9 }
 0x1da   : > { %1396 = vrot.lane.b32.xlu0 %v4367_v26, %s2662_s29 }
 0x1db   : > { %v1115_v40 = vpop.permute.xlu1 %1114  ;;  %v1623_v18 = vld [vmem:[#allocation2 + $0x70] sm:$0xff] }
 0x1dc   : > { %v1511_v24 = vpop.permute.xlu0 %1510  ;;  %1194 = vst.msk [vmem:[#allocation2 + $0x88] sm:$0xff] %vm1176_vm8, %v1115_v40  ;;  %2471 = vmatprep.mubr.msk.f32.mxu0 %vm1646_vm12, %v1623_v18 }
 0x1dd   : > { %1592 = vst.msk [vmem:[#allocation2 + $0x78] sm:$0xff] %vm1576_vm11, %v1511_v24  ;;  %1132 = vrot.lane.b32.xlu1 %v3347_v57, %s2660_s8 }
 0x1de   : > { %1000 = vrot.lane.b32.xlu0 %v4367_v26, %s2659_s7  ;;  %v1343_v26 = vsel %vm389_vm1, %v1341_v41, %v1342_v22 }
 0x1df   : > { %v848_v46 = vpop.permute.xlu1 %847 }
 0x1e0   : > { %v1244_v49 = vpop.permute.xlu0 %1243  ;;  %926 = vst.msk [vmem:[#allocation2 + $0x90] sm:$0xff] %vm907_vm6, %v848_v46 }
 0x1e1   : > { %1324 = vst.msk [vmem:[#allocation2 + $0x80] sm:$0xff] %vm1307_vm9, %v1244_v49  ;;  %1134 = vrot.lane.b32.xlu1 %v3342_v50, %s2660_s8 }
 0x1e2   : > { %1530 = vrot.lane.b32.xlu0 %v3342_v50, %s2663_s9  ;;  %v4368_v50 = vld [vmem:[#allocation38_spill] sm:$0xff] }
 0x1e3   : > { %v1379_v53 = vpop.permute.xlu1 %1378 }
 0x1e4   : > { %v1246_v20 = vpop.permute.xlu0 %1245  ;;  %1459 = vst.msk [vmem:[#allocation2 + $0x80] sm:$0xff] %vm1442_vm10, %v1379_v53  ;;  %v1624_v57 = vld [vmem:[#allocation2 + $0x78] sm:$0xff] }
 0x1e5   : > { %1325 = vst.msk [vmem:[#allocation2 + $0x88] sm:$0xff] %vm1307_vm9, %v1246_v20  ;;  %2472 = vmatmul.mubr.msk.f32.gmra.mrb[14].mxu0 %vm1646_vm12, %v1624_v57  ;;  %867 = vrot.lane.b32.xlu1 %v2972_v63, %s2658_s6 }
 0x1e6   : > { %1263 = vrot.lane.b32.xlu0 %v2972_v63, %s2661_s19 }
 0x1e7   : > { %v983_v54 = vpop.permute.xlu1 %982 }
 0x1e8   : > { %v850_v16 = vpop.permute.xlu0 %849  ;;  %1061 = vst.msk [vmem:[#allocation2 + $0x90] sm:$0xff] %vm1042_vm7, %v983_v54  ;;  %v1479_v54 = vsel %vm599_vm2, %v1476_v21, %v1478_v25 }
 0x1e9   : > { %927 = vst.msk [vmem:[#allocation2 + $0x98] sm:$0xff] %vm907_vm6, %v850_v16  ;;  %1398 = vrot.lane.b32.xlu1 %v4368_v50, %s2662_s29 }
 0x1ea   : > { %1265 = vrot.lane.b32.xlu0 %v2969_v62, %s2661_s19 }
 0x1eb   : > { %v1513_v14 = vpop.permute.xlu1 %1512 }
 0x1ec   : > { %v1381_v0 = vpop.permute.xlu0 %1380  ;;  %1593 = vst.msk [vmem:[#allocation2 + $0x80] sm:$0xff] %vm1576_vm11, %v1513_v14  ;;  %v1477_v14 = vsel %vm599_vm2, %v1475_v3, %v1476_v21 }
 0x1ed   : > { %1460 = vst.msk [vmem:[#allocation2 + $0x88] sm:$0xff] %vm1442_vm10, %v1381_v0  ;;  %1002 = vrot.lane.b32.xlu1 %v4368_v50, %s2659_s7 }
 0x1ee   : > { %869 = vrot.lane.b32.xlu0 %v2969_v62, %s2658_s6 }
 0x1ef   : > { %v1117_v63 = vpop.permute.xlu1 %1116 }
 0x1f0   : > { %v985_v48 = vpop.permute.xlu0 %984  ;;  %1195 = vst.msk [vmem:[#allocation2 + $0x90] sm:$0xff] %vm1176_vm8, %v1117_v63 }
 0x1f1   : > { %1062 = vst.msk [vmem:[#allocation2 + $0x98] sm:$0xff] %vm1042_vm7, %v985_v48  ;;  %1532 = vrot.lane.b32.xlu1 %v3360_v45, %s2663_s9 }
 0x1f2   : > { %1400 = vrot.lane.b32.xlu0 %v4369_v52, %s2662_s29 }
 0x1f3   : > { %v1119_v35 = vpop.permute.xlu1 %1118  ;;  %v1625_v30 = vld [vmem:[#allocation2 + $0x80] sm:$0xff] }
 0x1f4   : > { %v1515_v10 = vpop.permute.xlu0 %1514  ;;  %1196 = vst.msk [vmem:[#allocation2 + $0x98] sm:$0xff] %vm1176_vm8, %v1119_v35  ;;  %2474 = vmatprep.mubr.msk.f32.mxu1 %vm1646_vm12, %v1625_v30 }
 0x1f5   : > { %1594 = vst.msk [vmem:[#allocation2 + $0x88] sm:$0xff] %vm1576_vm11, %v1515_v10  ;;  %1136 = vrot.lane.b32.xlu1 %v3360_v45, %s2660_s8  ;;  %v942_v45 = vrot.slane %v303_v4, 1 }
 0x1f6   : > { %1004 = vrot.lane.b32.xlu0 %v4369_v52, %s2659_s7 }
 0x1f7   : > { %v852_v62 = vpop.permute.xlu1 %851  ;;  %v943_v29 = vsel %vm389_vm1, %v941_v12, %v942_v45 }
 0x1f8   : > { %v1248_v1 = vpop.permute.xlu0 %1247  ;;  %928 = vst.msk [vmem:[#allocation2 + $0xa0] sm:$0xff] %vm907_vm6, %v852_v62 }
 0x1f9   : > { %1326 = vst.msk [vmem:[#allocation2 + $0x90] sm:$0xff] %vm1307_vm9, %v1248_v1  ;;  %1138 = vrot.lane.b32.xlu1 %v3357_v55, %s2660_s8 }
 0x1fa   : > { %1534 = vrot.lane.b32.xlu0 %v3357_v55, %s2663_s9  ;;  %v304_v55 = vld [vmem:[%s2748_s30 + $0x190] sm:$0x3] }
 0x1fb   : > { %v1383_v51 = vpop.permute.xlu1 %1382  ;;  %v944_v39 = vrot.slane %v304_v55, 1  ;;  %v1078_v32 = vrot.slane %v304_v55, 2 }
 0x1fc   : > { %v1250_v27 = vpop.permute.xlu0 %1249  ;;  %1461 = vst.msk [vmem:[#allocation2 + $0x90] sm:$0xff] %vm1442_vm10, %v1383_v51  ;;  %v1626_v42 = vld [vmem:[#allocation2 + $0x88] sm:$0xff] }
 0x1fd   : > { %1327 = vst.msk [vmem:[#allocation2 + $0x98] sm:$0xff] %vm1307_vm9, %v1250_v27  ;;  %2475 = vmatmul.mubr.msk.f32.vlgmr.msra.gmra.mrb[0].mxu1 %vm1646_vm12, %v1626_v42  ;;  %871 = vrot.lane.b32.xlu1 %v302_v34, %s2658_s6  ;;  %v945_v19 = vsel %vm389_vm1, %v942_v45, %v944_v39  ;;  %v1079_v38 = vsel %vm599_vm2, %v1076_v23, %v1078_v32 }
 0x1fe   : > { %1267 = vrot.lane.b32.xlu0 %v302_v34, %s2661_s19 }
 0x1ff   : > { %v987_v2 = vpop.permute.xlu1 %986 }
 0x200   : > { %v854_v37 = vpop.permute.xlu0 %853  ;;  %1063 = vst.msk [vmem:[#allocation2 + $0xa0] sm:$0xff] %vm1042_vm7, %v987_v2 }
 0x201   : > { %929 = vst.msk [vmem:[#allocation2 + $0xa8] sm:$0xff] %vm907_vm6, %v854_v37  ;;  %1402 = vrot.lane.b32.xlu1 %v943_v29, %s2662_s29 }
 0x202   : > { %1269 = vrot.lane.b32.xlu0 %v303_v4, %s2661_s19 }
 0x203   : > { %v1517_v5 = vpop.permute.xlu1 %1516 }
 0x204   : > { %v1385_v8 = vpop.permute.xlu0 %1384  ;;  %1595 = vst.msk [vmem:[#allocation2 + $0x90] sm:$0xff] %vm1576_vm11, %v1517_v5 }
 0x205   : > { %1462 = vst.msk [vmem:[#allocation2 + $0x98] sm:$0xff] %vm1442_vm10, %v1385_v8  ;;  %1006 = vrot.lane.b32.xlu1 %v943_v29, %s2659_s7 }
 0x206   : > { %873 = vrot.lane.b32.xlu0 %v303_v4, %s2658_s6  ;;  %s2402_s6 = sshll.u32 %s2742_s26, 8  ;;  %s226_s26 = sand.u32 1, %s2638_s13  }
 0x207   : > { %v1121_v9 = vpop.permute.xlu1 %1120  ;;  %s2361_s10 = sshll.u32 %s226_s26, 3  ;;  %s2193_s15 = scalar_lea.sflag [#allocation4], %s226_s26 }
 0x208   : > { %v989_v47 = vpop.permute.xlu0 %988  ;;  %1197 = vst.msk [vmem:[#allocation2 + $0xa0] sm:$0xff] %vm1176_vm8, %v1121_v9  ;;  %s228_s18 = scalar_lea.vmem [#allocation3], %s2361_s10 }
 0x209   : > { %1064 = vst.msk [vmem:[#allocation2 + $0xa8] sm:$0xff] %vm1042_vm7, %v989_v47  ;;  %1536 = vrot.lane.b32.xlu1 %v1077_v11, %s2663_s9 }
 0x20a   : > { %1404 = vrot.lane.b32.xlu0 %v945_v19, %s2662_s29 }
 0x20b   : > { %v1123_v43 = vpop.permute.xlu1 %1122  ;;  %v1627_v7 = vld [vmem:[#allocation2 + $0x90] sm:$0xff] }
 0x20c   : > { %v1519_v59 = vpop.permute.xlu0 %1518  ;;  %1198 = vst.msk [vmem:[#allocation2 + $0xa8] sm:$0xff] %vm1176_vm8, %v1123_v43  ;;  %2477 = vmatprep.mubr.msk.f32.mxu1 %vm1646_vm12, %v1627_v7 }
 0x20d   : > { %1596 = vst.msk [vmem:[#allocation2 + $0x98] sm:$0xff] %vm1576_vm11, %v1519_v59  ;;  %1140 = vrot.lane.b32.xlu1 %v1077_v11, %s2660_s8 }
 0x20e   : > { %1008 = vrot.lane.b32.xlu0 %v945_v19, %s2659_s7 }
 0x20f   : > { %v856_v17 = vpop.permute.xlu1 %855 }
 0x210   : > { %v1252_v13 = vpop.permute.xlu0 %1251  ;;  %930 = vst.msk [vmem:[#allocation2 + $0xb0] sm:$0xff] %vm907_vm6, %v856_v17 }
 0x211   : > { %1328 = vst.msk [vmem:[#allocation2 + $0xa0] sm:$0xff] %vm1307_vm9, %v1252_v13  ;;  %1142 = vrot.lane.b32.xlu1 %v1079_v38, %s2660_s8  ;;  %s3966_s8 = scalar_lea.vmem %s4234_s2, %s2402_s6 }
 0x212   : > { %1538 = vrot.lane.b32.xlu0 %v1079_v38, %s2663_s9 }
 0x213   : > { %v1387_v56 = vpop.permute.xlu1 %1386 }
 0x214   : > { %v1254_v28 = vpop.permute.xlu0 %1253  ;;  %1463 = vst.msk [vmem:[#allocation2 + $0xa0] sm:$0xff] %vm1442_vm10, %v1387_v56  ;;  %v1628_v61 = vld [vmem:[#allocation2 + $0x98] sm:$0xff] }
 0x215   : > { %1329 = vst.msk [vmem:[#allocation2 + $0xa8] sm:$0xff] %vm1307_vm9, %v1254_v28  ;;  %2478 = vmatmul.mubr.msk.f32.gmra.mrb[2].mxu1 %vm1646_vm12, %v1628_v61  ;;  %1273 = vrot.lane.b32.xlu1 %v306_v44, %s2661_s19 }
 0x216   : > { %1271 = vrot.lane.b32.xlu0 %v305_v36, %s2661_s19  ;;  %s2211_s19 = sshll.u32 %s228_s18, 4  ;;  %s4186_s19 = int_to_ptr.vmem [resolvable:$true] %s2211_s19 }
 0x217   : > { %v2452_v58 = vpop.f32.mrb[0].mxu0  ;;  %v991_v15 = vpop.permute.xlu1 %990  ;;  %s2576_s28 = scalar_lea.vmem %s4186_s19, 128 }
 0x218   : > { %v858_v40 = vpop.permute.xlu0 %857  ;;  %1974 = vst.msk [vmem:[%s3966_s8 + $0x8] sm:$0xff] %vm1972_vm13, %v2452_v58  ;;  %v2006_v18 = vsel %vm1972_vm13, %v2452_v58, 0.0  ;;  %v2075_v24 = vmul.f32 %v2452_v58, %v2452_v58  ;;  %v1813_v46 = vpop.f32.mrb[1].mxu0  ;;  %p2577_p12 = scmp.ne.s32.totalorder %s4186_s19, %s2576_s28 }
 0x219   : > { %1065 = vst.msk [vmem:[#allocation2 + $0xb0] sm:$0xff] %vm1042_vm7, %v991_v15  ;;  %v2005_v49 = vsel %vm1972_vm13, %v1813_v46, 0.0  ;;  %v2074_v53 = vmul.f32 %v1813_v46, %v1813_v46  ;;  %1408 = vrot.lane.b32.xlu1 %v1345_v60, %s2662_s29 }
 0x21a   : > { %931 = vst.msk [vmem:[#allocation2 + $0xb8] sm:$0xff] %vm907_vm6, %v858_v40  ;;  %v2107_v20 = vsel %vm1972_vm13, %v2075_v24, 0.0  ;;  %v2007_v57 = vadd.f32 %v2006_v18, %v2005_v49  ;;  %1406 = vrot.lane.b32.xlu0 %v1343_v26, %s2662_s29  ;;  %p2578_p13 = pnand %p2577_p12, %p2725_p4  ;;  %s2664_s29 = smov [#allocation3]  }
 0x21b   : > { %1973 = vst.msk [vmem:[%s3966_s8] sm:$0xff] %vm1972_vm13, %v1813_v46  ;;  %v2106_v16 = vsel %vm1972_vm13, %v2074_v53, 0.0  ;;  %v1521_v50 = vpop.permute.xlu1 %1520  ;;  %s2580_s4 = sshll.u32 %s2664_s29, 4  ;;  %s2581_s4 = int_to_ptr.vmem [resolvable:$false] %s2580_s4 }
 0x21c   : > { %v2108_v0 = vadd.f32 %v2107_v20, %v2106_v16  ;;  %v1389_v63 = vpop.permute.xlu0 %1388  ;;  %1597 = vst.msk [vmem:[#allocation2 + $0xa0] sm:$0xff] %vm1576_vm11, %v1521_v50  ;;  %p2579_p0 = pneg %p2578_p13  ;;  %s2582_s5 = scalar_lea.vmem %s2581_s4, 256 }
 0x21d   : > { %1464 = vst.msk [vmem:[#allocation2 + $0xa8] sm:$0xff] %vm1442_vm10, %v1389_v63  ;;  %1542 = vrot.lane.b32.xlu1 %v1479_v54, %s2663_s9  ;;  %p2583_p1 = scmp.lt.s32.totalorder %s4186_s19, %s2581_s4  ;;  %p2584_p2 = scmp.lt.s32.totalorder %s2582_s5, %s2576_s28 }
 0x21e   : > { %1540 = vrot.lane.b32.xlu0 %v1477_v14, %s2663_s9 }
 0x21f   : > { %v1125_v48 = vpop.permute.xlu1 %1124  ;;  %p2585_p3 = por %p2584_p2, %p2583_p1 }
 0x220   : > { %v993_v52 = vpop.permute.xlu0 %992  ;;  %1199 = vst.msk [vmem:[#allocation2 + $0xb0] sm:$0xff] %vm1176_vm8, %v1125_v48 }
 0x221   : > { %1066 = vst.msk [vmem:[#allocation2 + $0xb8] sm:$0xff] %vm1042_vm7, %v993_v52  ;;  %p2586_p5 = pnand %p2585_p3, %p2579_p0 }
 0x223   : > { %v1127_v35 = vpop.permute.xlu1 %1126  ;;  %v1629_v30 = vld [vmem:[#allocation2 + $0xa0] sm:$0xff] }
 0x224   : > { %v1523_v10 = vpop.permute.xlu0 %1522  ;;  %1200 = vst.msk [vmem:[#allocation2 + $0xb8] sm:$0xff] %vm1176_vm8, %v1127_v35  ;;  %2480 = vmatprep.mubr.msk.f32.mxu1 %vm1646_vm12, %v1629_v30 }
 0x225   : > { %1598 = vst.msk [vmem:[#allocation2 + $0xa8] sm:$0xff] %vm1576_vm11, %v1523_v10 }
 0x227   : > { %v860_v62 = vpop.permute.xlu1 %859 }
 0x228   : > { %v1256_v4 = vpop.permute.xlu0 %1255  ;;  %932 = vst.msk [vmem:[#allocation2 + $0xc0] sm:$0xff] %vm907_vm6, %v860_v62 }
 0x229   : > { %1330 = vst.msk [vmem:[#allocation2 + $0xb0] sm:$0xff] %vm1307_vm9, %v1256_v4 }
 0x22b   : > { %v2455_v1 = vpop.f32.mrb[2].mxu0  ;;  %v1391_v34 = vpop.permute.xlu1 %1390 }
 0x22c   : > { %v1258_v12 = vpop.permute.xlu0 %1257  ;;  %1976 = vst.msk [vmem:[%s3966_s8 + $0x18] sm:$0xff] %vm1972_vm13, %v2455_v1  ;;  %v1823_v45 = vpop.f32.mrb[3].mxu0  ;;  %v1630_v51 = vld [vmem:[#allocation2 + $0xa8] sm:$0xff]  ;;  %v2077_v27 = vmul.f32 %v2455_v1, %v2455_v1  ;;  %v2010_v37 = vsel %vm1972_vm13, %v2455_v1, 0.0 }
 0x22d   : > { %1465 = vst.msk [vmem:[#allocation2 + $0xb0] sm:$0xff] %vm1442_vm10, %v1391_v34  ;;  %v2008_v42 = vsel %vm1972_vm13, %v1823_v45, 0.0  ;;  %v2076_v29 = vmul.f32 %v1823_v45, %v1823_v45  ;;  %2481 = vmatmul.mubr.msk.f32.gmra.mrb[4].mxu1 %vm1646_vm12, %v1630_v51 }
 0x22e   : > { %1331 = vst.msk [vmem:[#allocation2 + $0xb8] sm:$0xff] %vm1307_vm9, %v1258_v12  ;;  %v2009_v2 = vadd.f32 %v2008_v42, %v2007_v57  ;;  %v2111_v8 = vsel %vm1972_vm13, %v2077_v27, 0.0 }
 0x22f   : > { %1975 = vst.msk [vmem:[%s3966_s8 + $0x10] sm:$0xff] %vm1972_vm13, %v1823_v45  ;;  %v2109_v55 = vsel %vm1972_vm13, %v2076_v29, 0.0  ;;  %v995_v6 = vpop.permute.xlu1 %994 }
 0x230   : > { %v2110_v23 = vadd.f32 %v2109_v55, %v2108_v0  ;;  %v862_v5 = vpop.permute.xlu0 %861  ;;  %1067 = vst.msk [vmem:[#allocation2 + $0xc0] sm:$0xff] %vm1042_vm7, %v995_v6  ;;  %v2011_v39 = vadd.f32 %v2010_v37, %v2009_v2 }
 0x231   : > { %933 = vst.msk [vmem:[#allocation2 + $0xc8] sm:$0xff] %vm907_vm6, %v862_v5 }
 0x232   : > { %v2112_v11 = vadd.f32 %v2111_v8, %v2110_v23 }
 0x233   : > { %v1525_v9 = vpop.permute.xlu1 %1524 }
 0x234   : > { %v1393_v19 = vpop.permute.xlu0 %1392  ;;  %1599 = vst.msk [vmem:[#allocation2 + $0xb0] sm:$0xff] %vm1576_vm11, %v1525_v9 }
 0x235   : > { %1466 = vst.msk [vmem:[#allocation2 + $0xb8] sm:$0xff] %vm1442_vm10, %v1393_v19 }
 0x237   : > { %v1129_v47 = vpop.permute.xlu1 %1128 }
 0x238   : > { %v997_v32 = vpop.permute.xlu0 %996  ;;  %1201 = vst.msk [vmem:[#allocation2 + $0xc0] sm:$0xff] %vm1176_vm8, %v1129_v47 }
 0x239   : > { %1068 = vst.msk [vmem:[#allocation2 + $0xc8] sm:$0xff] %vm1042_vm7, %v997_v32 }
 0x23b   : > { %v1131_v43 = vpop.permute.xlu1 %1130  ;;  %v1631_v7 = vld [vmem:[#allocation2 + $0xb0] sm:$0xff] }
 0x23c   : > { %v1527_v59 = vpop.permute.xlu0 %1526  ;;  %1202 = vst.msk [vmem:[#allocation2 + $0xc8] sm:$0xff] %vm1176_vm8, %v1131_v43  ;;  %2483 = vmatprep.mubr.msk.f32.mxu1 %vm1646_vm12, %v1631_v7 }
 0x23d   : > { %1600 = vst.msk [vmem:[#allocation2 + $0xb8] sm:$0xff] %vm1576_vm11, %v1527_v59 }
 0x23f   : > { %v2458_v38 = vpop.f32.mrb[4].mxu0  ;;  %v864_v17 = vpop.permute.xlu1 %863 }
 0x240   : > { %v1260_v44 = vpop.permute.xlu0 %1259  ;;  %1978 = vst.msk [vmem:[%s3966_s8 + $0x28] sm:$0xff] %vm1972_vm13, %v2458_v38  ;;  %v1833_v31 = vpop.f32.mrb[5].mxu0  ;;  %v2079_v13 = vmul.f32 %v2458_v38, %v2458_v38  ;;  %v2014_v56 = vsel %vm1972_vm13, %v2458_v38, 0.0 }
 0x241   : > { %934 = vst.msk [vmem:[#allocation2 + $0xd0] sm:$0xff] %vm907_vm6, %v864_v17  ;;  %v2012_v36 = vsel %vm1972_vm13, %v1833_v31, 0.0  ;;  %v2078_v22 = vmul.f32 %v1833_v31, %v1833_v31 }
 0x242   : > { %1332 = vst.msk [vmem:[#allocation2 + $0xc0] sm:$0xff] %vm1307_vm9, %v1260_v44  ;;  %v2013_v33 = vadd.f32 %v2012_v36, %v2011_v39  ;;  %v2115_v3 = vsel %vm1972_vm13, %v2079_v13, 0.0 }
 0x243   : > { %1977 = vst.msk [vmem:[%s3966_s8 + $0x20] sm:$0xff] %vm1972_vm13, %v1833_v31  ;;  %v2113_v41 = vsel %vm1972_vm13, %v2078_v22, 0.0  ;;  %v1395_v28 = vpop.permute.xlu1 %1394 }
 0x244   : > { %v2114_v61 = vadd.f32 %v2113_v41, %v2112_v11  ;;  %v1262_v21 = vpop.permute.xlu0 %1261  ;;  %1467 = vst.msk [vmem:[#allocation2 + $0xc0] sm:$0xff] %vm1442_vm10, %v1395_v28  ;;  %v1632_v60 = vld [vmem:[#allocation2 + $0xb8] sm:$0xff]  ;;  %v2015_v25 = vadd.f32 %v2014_v56, %v2013_v33 }
 0x245   : > { %1333 = vst.msk [vmem:[#allocation2 + $0xc8] sm:$0xff] %vm1307_vm9, %v1262_v21  ;;  %2484 = vmatmul.mubr.msk.f32.gmra.mrb[6].mxu1 %vm1646_vm12, %v1632_v60 }
 0x246   : > { %v2116_v58 = vadd.f32 %v2115_v3, %v2114_v61 }
 0x247   : > { %v999_v15 = vpop.permute.xlu1 %998 }
 0x248   : > { %v866_v26 = vpop.permute.xlu0 %865  ;;  %1069 = vst.msk [vmem:[#allocation2 + $0xd0] sm:$0xff] %vm1042_vm7, %v999_v15 }
 0x249   : > { %935 = vst.msk [vmem:[#allocation2 + $0xd8] sm:$0xff] %vm907_vm6, %v866_v26 }
 0x24b   : > { %v1529_v40 = vpop.permute.xlu1 %1528 }
 0x24c   : > { %v1397_v18 = vpop.permute.xlu0 %1396  ;;  %1601 = vst.msk [vmem:[#allocation2 + $0xc0] sm:$0xff] %vm1576_vm11, %v1529_v40 }
 0x24d   : > { %1468 = vst.msk [vmem:[#allocation2 + $0xc8] sm:$0xff] %vm1442_vm10, %v1397_v18 }
 0x24f   : > { %v1133_v24 = vpop.permute.xlu1 %1132 }
 0x250   : > { %v1001_v46 = vpop.permute.xlu0 %1000  ;;  %1203 = vst.msk [vmem:[#allocation2 + $0xd0] sm:$0xff] %vm1176_vm8, %v1133_v24 }
 0x251   : > { %1070 = vst.msk [vmem:[#allocation2 + $0xd8] sm:$0xff] %vm1042_vm7, %v1001_v46 }
 0x253   : > { %v1135_v49 = vpop.permute.xlu1 %1134  ;;  %v1633_v53 = vld [vmem:[#allocation2 + $0xc0] sm:$0xff] }
 0x254   : > { %v1531_v20 = vpop.permute.xlu0 %1530  ;;  %1204 = vst.msk [vmem:[#allocation2 + $0xd8] sm:$0xff] %vm1176_vm8, %v1135_v49  ;;  %2486 = vmatprep.mubr.msk.f32.mxu1 %vm1646_vm12, %v1633_v53 }
 0x255   : > { %1602 = vst.msk [vmem:[#allocation2 + $0xc8] sm:$0xff] %vm1576_vm11, %v1531_v20 }
 0x257   : > { %v868_v57 = vpop.permute.xlu1 %867 }
 0x258   : > { %v1264_v54 = vpop.permute.xlu0 %1263  ;;  %v2461_v16 = vpop.f32.mrb[6].mxu0  ;;  %936 = vst.msk [vmem:[#allocation2 + $0xe0] sm:$0xff] %vm907_vm6, %v868_v57 }
 0x259   : > { %1334 = vst.msk [vmem:[#allocation2 + $0xd0] sm:$0xff] %vm1307_vm9, %v1264_v54  ;;  %v1843_v50 = vpop.f32.mrb[7].mxu0  ;;  %v2081_v14 = vmul.f32 %v2461_v16, %v2461_v16  ;;  %v2018_v35 = vsel %vm1972_vm13, %v2461_v16, 0.0 }
 0x25a   : > { %1980 = vst.msk [vmem:[%s3966_s8 + $0x38] sm:$0xff] %vm1972_vm13, %v2461_v16  ;;  %1979 = vst.msk [vmem:[%s3966_s8 + $0x30] sm:$0xff] %vm1972_vm13, %v1843_v50  ;;  %v2016_v0 = vsel %vm1972_vm13, %v1843_v50, 0.0  ;;  %v2080_v63 = vmul.f32 %v1843_v50, %v1843_v50 }
 0x25b   : > { %v2017_v48 = vadd.f32 %v2016_v0, %v2015_v25  ;;  %v1399_v52 = vpop.permute.xlu1 %1398  ;;  %v2119_v34 = vsel %vm1972_vm13, %v2081_v14, 0.0 }
 0x25c   : > { %v2117_v30 = vsel %vm1972_vm13, %v2080_v63, 0.0  ;;  %v1266_v10 = vpop.permute.xlu0 %1265  ;;  %1469 = vst.msk [vmem:[#allocation2 + $0xd0] sm:$0xff] %vm1442_vm10, %v1399_v52  ;;  %v1634_v62 = vld [vmem:[#allocation2 + $0xc8] sm:$0xff] }
 0x25d   : > { %v2118_v4 = vadd.f32 %v2117_v30, %v2116_v58  ;;  %1335 = vst.msk [vmem:[#allocation2 + $0xd8] sm:$0xff] %vm1307_vm9, %v1266_v10  ;;  %2487 = vmatmul.mubr.msk.f32.gmra.mrb[8].mxu1 %vm1646_vm12, %v1634_v62  ;;  %v2019_v1 = vadd.f32 %v2018_v35, %v2017_v48 }
 0x25f   : > { %v1003_v12 = vpop.permute.xlu1 %1002  ;;  %v2120_v45 = vadd.f32 %v2119_v34, %v2118_v4 }
 0x260   : > { %v870_v51 = vpop.permute.xlu0 %869  ;;  %1071 = vst.msk [vmem:[#allocation2 + $0xe0] sm:$0xff] %vm1042_vm7, %v1003_v12 }
 0x261   : > { %937 = vst.msk [vmem:[#allocation2 + $0xe8] sm:$0xff] %vm907_vm6, %v870_v51 }
 0x263   : > { %v1533_v27 = vpop.permute.xlu1 %1532 }
 0x264   : > { %v1401_v42 = vpop.permute.xlu0 %1400  ;;  %1603 = vst.msk [vmem:[#allocation2 + $0xd0] sm:$0xff] %vm1576_vm11, %v1533_v27 }
 0x265   : > { %1470 = vst.msk [vmem:[#allocation2 + $0xd8] sm:$0xff] %vm1442_vm10, %v1401_v42 }
 0x267   : > { %v1137_v29 = vpop.permute.xlu1 %1136 }
 0x268   : > { %v1005_v2 = vpop.permute.xlu0 %1004  ;;  %1205 = vst.msk [vmem:[#allocation2 + $0xe0] sm:$0xff] %vm1176_vm8, %v1137_v29 }
 0x269   : > { %1072 = vst.msk [vmem:[#allocation2 + $0xe8] sm:$0xff] %vm1042_vm7, %v1005_v2 }
 0x26b   : > { %v1139_v37 = vpop.permute.xlu1 %1138  ;;  %v1635_v55 = vld [vmem:[#allocation2 + $0xd0] sm:$0xff] }
 0x26c   : > { %v1535_v6 = vpop.permute.xlu0 %1534  ;;  %1206 = vst.msk [vmem:[#allocation2 + $0xe8] sm:$0xff] %vm1176_vm8, %v1139_v37  ;;  %2489 = vmatprep.mubr.msk.f32.mxu1 %vm1646_vm12, %v1635_v55 }
 0x26d   : > { %1604 = vst.msk [vmem:[#allocation2 + $0xd8] sm:$0xff] %vm1576_vm11, %v1535_v6 }
 0x26f   : > { %v872_v23 = vpop.permute.xlu1 %871 }
 0x270   : > { %v1268_v5 = vpop.permute.xlu0 %1267  ;;  %v2464_v39 = vpop.f32.mrb[8].mxu0  ;;  %938 = vst.msk [vmem:[#allocation2 + $0xf0] sm:$0xff] %vm907_vm6, %v872_v23 }
 0x271   : > { %1336 = vst.msk [vmem:[#allocation2 + $0xe0] sm:$0xff] %vm1307_vm9, %v1268_v5  ;;  %v1853_v8 = vpop.f32.mrb[9].mxu0  ;;  %v2083_v11 = vmul.f32 %v2464_v39, %v2464_v39  ;;  %v2022_v43 = vsel %vm1972_vm13, %v2464_v39, 0.0 }
 0x272   : > { %1982 = vst.msk [vmem:[%s3966_s8 + $0x48] sm:$0xff] %vm1972_vm13, %v2464_v39  ;;  %1981 = vst.msk [vmem:[%s3966_s8 + $0x40] sm:$0xff] %vm1972_vm13, %v1853_v8  ;;  %v2020_v9 = vsel %vm1972_vm13, %v1853_v8, 0.0  ;;  %v2082_v19 = vmul.f32 %v1853_v8, %v1853_v8 }
 0x273   : > { %v2021_v47 = vadd.f32 %v2020_v9, %v2019_v1  ;;  %v1403_v32 = vpop.permute.xlu1 %1402  ;;  %v2123_v31 = vsel %vm1972_vm13, %v2083_v11, 0.0 }
 0x274   : > { %v2121_v7 = vsel %vm1972_vm13, %v2082_v19, 0.0  ;;  %v1270_v59 = vpop.permute.xlu0 %1269  ;;  %1471 = vst.msk [vmem:[#allocation2 + $0xe0] sm:$0xff] %vm1442_vm10, %v1403_v32  ;;  %v1636_v38 = vld [vmem:[#allocation2 + $0xd8] sm:$0xff] }
 0x275   : > { %v2122_v17 = vadd.f32 %v2121_v7, %v2120_v45  ;;  %1337 = vst.msk [vmem:[#allocation2 + $0xe8] sm:$0xff] %vm1307_vm9, %v1270_v59  ;;  %2490 = vmatmul.mubr.msk.f32.gmra.mrb[10].mxu1 %vm1646_vm12, %v1636_v38  ;;  %v2023_v44 = vadd.f32 %v2022_v43, %v2021_v47 }
 0x277   : > { %v1007_v13 = vpop.permute.xlu1 %1006  ;;  %v2124_v36 = vadd.f32 %v2123_v31, %v2122_v17 }
 0x278   : > { %v874_v22 = vpop.permute.xlu0 %873  ;;  %1073 = vst.msk [vmem:[#allocation2 + $0xf0] sm:$0xff] %vm1042_vm7, %v1007_v13 }
 0x279   : > { %939 = vst.msk [vmem:[#allocation2 + $0xf8] sm:$0xff] %vm907_vm6, %v874_v22 }
 0x27b   : > { %v1537_v33 = vpop.permute.xlu1 %1536 }
 0x27c   : > { %v1405_v56 = vpop.permute.xlu0 %1404  ;;  %1605 = vst.msk [vmem:[#allocation2 + $0xe0] sm:$0xff] %vm1576_vm11, %v1537_v33 }
 0x27d   : > { %1472 = vst.msk [vmem:[#allocation2 + $0xe8] sm:$0xff] %vm1442_vm10, %v1405_v56 }
 0x27f   : > { %v1141_v41 = vpop.permute.xlu1 %1140 }
 0x280   : > { %v1009_v28 = vpop.permute.xlu0 %1008  ;;  %1207 = vst.msk [vmem:[#allocation2 + $0xf0] sm:$0xff] %vm1176_vm8, %v1141_v41 }
 0x281   : > { %1074 = vst.msk [vmem:[#allocation2 + $0xf8] sm:$0xff] %vm1042_vm7, %v1009_v28 }
 0x283   : > { %v1143_v61 = vpop.permute.xlu1 %1142  ;;  %v1637_v21 = vld [vmem:[#allocation2 + $0xe0] sm:$0xff] }
 0x284   : > { %v1539_v60 = vpop.permute.xlu0 %1538  ;;  %1208 = vst.msk [vmem:[#allocation2 + $0xf8] sm:$0xff] %vm1176_vm8, %v1143_v61  ;;  %2492 = vmatprep.mubr.msk.f32.mxu1 %vm1646_vm12, %v1637_v21 }
 0x285   : > { %1606 = vst.msk [vmem:[#allocation2 + $0xe8] sm:$0xff] %vm1576_vm11, %v1539_v60 }
 0x287   : > { %v1274_v25 = vpop.permute.xlu1 %1273 }
 0x288   : > { %v1272_v3 = vpop.permute.xlu0 %1271  ;;  %v2467_v58 = vpop.f32.mrb[10].mxu0  ;;  %1339 = vst.msk [vmem:[#allocation2 + $0xf8] sm:$0xff] %vm1307_vm9, %v1274_v25 }
 0x289   : > { %1338 = vst.msk [vmem:[#allocation2 + $0xf0] sm:$0xff] %vm1307_vm9, %v1272_v3  ;;  %v1863_v15 = vpop.f32.mrb[11].mxu0  ;;  %v2085_v26 = vmul.f32 %v2467_v58, %v2467_v58  ;;  %v2026_v49 = vsel %vm1972_vm13, %v2467_v58, 0.0 }
 0x28a   : > { %1984 = vst.msk [vmem:[%s3966_s8 + $0x58] sm:$0xff] %vm1972_vm13, %v2467_v58  ;;  %1983 = vst.msk [vmem:[%s3966_s8 + $0x50] sm:$0xff] %vm1972_vm13, %v1863_v15  ;;  %v2024_v40 = vsel %vm1972_vm13, %v1863_v15, 0.0  ;;  %v2084_v18 = vmul.f32 %v1863_v15, %v1863_v15 }
 0x28b   : > { %v2025_v24 = vadd.f32 %v2024_v40, %v2023_v44  ;;  %v1409_v46 = vpop.permute.xlu1 %1408  ;;  %v2127_v50 = vsel %vm1972_vm13, %v2085_v26, 0.0 }
 0x28c   : > { %v2125_v53 = vsel %vm1972_vm13, %v2084_v18, 0.0  ;;  %v1407_v20 = vpop.permute.xlu0 %1406  ;;  %1474 = vst.msk [vmem:[#allocation2 + $0xf8] sm:$0xff] %vm1442_vm10, %v1409_v46  ;;  %v1638_v57 = vld [vmem:[#allocation2 + $0xe8] sm:$0xff] }
 0x28d   : > { %v2126_v54 = vadd.f32 %v2125_v53, %v2124_v36  ;;  %1473 = vst.msk [vmem:[#allocation2 + $0xf0] sm:$0xff] %vm1442_vm10, %v1407_v20  ;;  %2493 = vmatmul.mubr.msk.f32.gmra.mrb[12].mxu1 %vm1646_vm12, %v1638_v57  ;;  %v2027_v16 = vadd.f32 %v2026_v49, %v2025_v24 }
 0x28f   : > { %v1543_v14 = vpop.permute.xlu1 %1542  ;;  %v2128_v0 = vadd.f32 %v2127_v50, %v2126_v54 }
 0x290   : > { %v1541_v63 = vpop.permute.xlu0 %1540  ;;  %1608 = vst.msk [vmem:[#allocation2 + $0xf8] sm:$0xff] %vm1576_vm11, %v1543_v14 }
 0x291   : > { %1607 = vst.msk [vmem:[#allocation2 + $0xf0] sm:$0xff] %vm1576_vm11, %v1541_v63 }
 0x297   : > { %v1640_v48 = vld [vmem:[#allocation2 + $0xf8] sm:$0xff] }
 0x298   : > { %v1639_v52 = vld [vmem:[#allocation2 + $0xf0] sm:$0xff] }
 0x299   : > { %2495 = vmatprep.mubr.msk.f32.mxu1 %vm1646_vm12, %v1639_v52 }
 0x29a   : > { %2496 = vmatmul.mubr.msk.f32.gmra.mrb[14].mxu1 %vm1646_vm12, %v1640_v48 }
 0x2a0   : > { %v2470_v35 = vpop.f32.mrb[12].mxu0 }
 0x2a1   : > { %1986 = vst.msk [vmem:[%s3966_s8 + $0x68] sm:$0xff] %vm1972_vm13, %v2470_v35  ;;  %v1873_v30 = vpop.f32.mrb[13].mxu0  ;;  %v2087_v10 = vmul.f32 %v2470_v35, %v2470_v35  ;;  %v2030_v34 = vsel %vm1972_vm13, %v2470_v35, 0.0 }
 0x2a2   : > { %1985 = vst.msk [vmem:[%s3966_s8 + $0x60] sm:$0xff] %vm1972_vm13, %v1873_v30  ;;  %v2028_v62 = vsel %vm1972_vm13, %v1873_v30, 0.0  ;;  %v2086_v4 = vmul.f32 %v1873_v30, %v1873_v30 }
 0x2a3   : > { %v2029_v1 = vadd.f32 %v2028_v62, %v2027_v16  ;;  %v2131_v27 = vsel %vm1972_vm13, %v2087_v10, 0.0 }
 0x2a4   : > { %v2129_v12 = vsel %vm1972_vm13, %v2086_v4, 0.0 }
 0x2a5   : > { %v2130_v45 = vadd.f32 %v2129_v12, %v2128_v0  ;;  %v2031_v51 = vadd.f32 %v2030_v34, %v2029_v1 }
 0x2a7   : > { %v2132_v42 = vadd.f32 %v2131_v27, %v2130_v45 }
 0x2b8   : > { %v2473_v29 = vpop.f32.mrb[14].mxu0 }
 0x2b9   : > { %1988 = vst.msk [vmem:[%s3966_s8 + $0x78] sm:$0xff] %vm1972_vm13, %v2473_v29  ;;  %v1883_v2 = vpop.f32.mrb[15].mxu0  ;;  %v2089_v37 = vmul.f32 %v2473_v29, %v2473_v29  ;;  %v2034_v5 = vsel %vm1972_vm13, %v2473_v29, 0.0 }
 0x2ba   : > { %1987 = vst.msk [vmem:[%s3966_s8 + $0x70] sm:$0xff] %vm1972_vm13, %v1883_v2  ;;  %v2032_v55 = vsel %vm1972_vm13, %v1883_v2, 0.0  ;;  %v2088_v6 = vmul.f32 %v1883_v2, %v1883_v2 }
 0x2bb   : > { %v2033_v23 = vadd.f32 %v2032_v55, %v2031_v51  ;;  %v2135_v9 = vsel %vm1972_vm13, %v2089_v37, 0.0 }
 0x2bc   : > { %v2133_v39 = vsel %vm1972_vm13, %v2088_v6, 0.0 }
 0x2bd   : > { %v2035_v8 = vadd.f32 %v2034_v5, %v2033_v23  ;;  %v2134_v11 = vadd.f32 %v2133_v39, %v2132_v42 }
 0x2bf   : > { %v2136_v19 = vadd.f32 %v2135_v9, %v2134_v11 }
 0x2d0   : > { %v2476_v47 = vpop.f32.mrb[0].mxu1 }
 0x2d1   : > { %1990 = vst.msk [vmem:[%s3966_s8 + $0x88] sm:$0xff] %vm1972_vm13, %v2476_v47  ;;  %v1893_v32 = vpop.f32.mrb[1].mxu1  ;;  %v2091_v43 = vmul.f32 %v2476_v47, %v2476_v47  ;;  %v2038_v17 = vsel %vm1972_vm13, %v2476_v47, 0.0 }
 0x2d2   : > { %1989 = vst.msk [vmem:[%s3966_s8 + $0x80] sm:$0xff] %vm1972_vm13, %v1893_v32  ;;  %v2036_v7 = vsel %vm1972_vm13, %v1893_v32, 0.0  ;;  %v2090_v59 = vmul.f32 %v1893_v32, %v1893_v32 }
 0x2d3   : > { %v2037_v38 = vadd.f32 %v2036_v7, %v2035_v8  ;;  %v2139_v36 = vsel %vm1972_vm13, %v2091_v43, 0.0 }
 0x2d4   : > { %v2137_v44 = vsel %vm1972_vm13, %v2090_v59, 0.0 }
 0x2d5   : > { %v2138_v31 = vadd.f32 %v2137_v44, %v2136_v19  ;;  %v2039_v13 = vadd.f32 %v2038_v17, %v2037_v38 }
 0x2d7   : > { %v2140_v22 = vadd.f32 %v2139_v36, %v2138_v31 }
 0x2e8   : > { %v2479_v33 = vpop.f32.mrb[2].mxu1 }
 0x2e9   : > { %1992 = vst.msk [vmem:[%s3966_s8 + $0x98] sm:$0xff] %vm1972_vm13, %v2479_v33  ;;  %v1903_v56 = vpop.f32.mrb[3].mxu1  ;;  %v2093_v41 = vmul.f32 %v2479_v33, %v2479_v33  ;;  %v2042_v60 = vsel %vm1972_vm13, %v2479_v33, 0.0 }
 0x2ea   : > { %1991 = vst.msk [vmem:[%s3966_s8 + $0x90] sm:$0xff] %vm1972_vm13, %v1903_v56  ;;  %v2040_v28 = vsel %vm1972_vm13, %v1903_v56, 0.0  ;;  %v2092_v61 = vmul.f32 %v1903_v56, %v1903_v56 }
 0x2eb   : > { %v2041_v21 = vadd.f32 %v2040_v28, %v2039_v13  ;;  %v2143_v15 = vsel %vm1972_vm13, %v2093_v41, 0.0 }
 0x2ec   : > { %v2141_v25 = vsel %vm1972_vm13, %v2092_v61, 0.0 }
 0x2ed   : > { %v2142_v3 = vadd.f32 %v2141_v25, %v2140_v22  ;;  %v2043_v58 = vadd.f32 %v2042_v60, %v2041_v21 }
 0x2ef   : > { %v2144_v26 = vadd.f32 %v2143_v15, %v2142_v3 }
 0x300   : > { %v2482_v40 = vpop.f32.mrb[4].mxu1 }
 0x301   : > { %1994 = vst.msk [vmem:[%s3966_s8 + $0xa8] sm:$0xff] %vm1972_vm13, %v2482_v40  ;;  %v1913_v18 = vpop.f32.mrb[5].mxu1  ;;  %v2095_v24 = vmul.f32 %v2482_v40, %v2482_v40  ;;  %v2046_v20 = vsel %vm1972_vm13, %v2482_v40, 0.0 }
 0x302   : > { %1993 = vst.msk [vmem:[%s3966_s8 + $0xa0] sm:$0xff] %vm1972_vm13, %v1913_v18  ;;  %v2044_v46 = vsel %vm1972_vm13, %v1913_v18, 0.0  ;;  %v2094_v49 = vmul.f32 %v1913_v18, %v1913_v18 }
 0x303   : > { %v2045_v53 = vadd.f32 %v2044_v46, %v2043_v58  ;;  %v2147_v50 = vsel %vm1972_vm13, %v2095_v24, 0.0 }
 0x304   : > { %v2145_v57 = vsel %vm1972_vm13, %v2094_v49, 0.0 }
 0x305   : > { %v2146_v54 = vadd.f32 %v2145_v57, %v2144_v26  ;;  %v2047_v16 = vadd.f32 %v2046_v20, %v2045_v53 }
 0x307   : > { %v2148_v14 = vadd.f32 %v2147_v50, %v2146_v54 }
 0x318   : > { %v2485_v0 = vpop.f32.mrb[6].mxu1 }
 0x319   : > { %1996 = vst.msk [vmem:[%s3966_s8 + $0xb8] sm:$0xff] %vm1972_vm13, %v2485_v0  ;;  %v1923_v63 = vpop.f32.mrb[7].mxu1  ;;  %v2097_v48 = vmul.f32 %v2485_v0, %v2485_v0  ;;  %v2050_v10 = vsel %vm1972_vm13, %v2485_v0, 0.0 }
 0x31a   : > { %1995 = vst.msk [vmem:[%s3966_s8 + $0xb0] sm:$0xff] %vm1972_vm13, %v1923_v63  ;;  %v2048_v52 = vsel %vm1972_vm13, %v1923_v63, 0.0  ;;  %v2096_v35 = vmul.f32 %v1923_v63, %v1923_v63 }
 0x31b   : > { %v2049_v30 = vadd.f32 %v2048_v52, %v2047_v16  ;;  %v2151_v34 = vsel %vm1972_vm13, %v2097_v48, 0.0 }
 0x31c   : > { %v2149_v62 = vsel %vm1972_vm13, %v2096_v35, 0.0 }
 0x31d   : > { %v2150_v4 = vadd.f32 %v2149_v62, %v2148_v14  ;;  %v2051_v1 = vadd.f32 %v2050_v10, %v2049_v30 }
 0x31f   : > { %v2152_v12 = vadd.f32 %v2151_v34, %v2150_v4 }
 0x330   : > { %v2488_v45 = vpop.f32.mrb[8].mxu1 }
 0x331   : > { %1998 = vst.msk [vmem:[%s3966_s8 + $0xc8] sm:$0xff] %vm1972_vm13, %v2488_v45  ;;  %v1933_v51 = vpop.f32.mrb[9].mxu1  ;;  %v2099_v27 = vmul.f32 %v2488_v45, %v2488_v45  ;;  %v2054_v37 = vsel %vm1972_vm13, %v2488_v45, 0.0 }
 0x332   : > { %1997 = vst.msk [vmem:[%s3966_s8 + $0xc0] sm:$0xff] %vm1972_vm13, %v1933_v51  ;;  %v2052_v42 = vsel %vm1972_vm13, %v1933_v51, 0.0  ;;  %v2098_v29 = vmul.f32 %v1933_v51, %v1933_v51 }
 0x333   : > { %v2053_v2 = vadd.f32 %v2052_v42, %v2051_v1  ;;  %v2155_v5 = vsel %vm1972_vm13, %v2099_v27, 0.0 }
 0x334   : > { %v2153_v55 = vsel %vm1972_vm13, %v2098_v29, 0.0 }
 0x335   : > { %v2154_v6 = vadd.f32 %v2153_v55, %v2152_v12  ;;  %v2055_v23 = vadd.f32 %v2054_v37, %v2053_v2 }
 0x337   : > { %v2156_v39 = vadd.f32 %v2155_v5, %v2154_v6 }
 0x348   : > { %v2491_v8 = vpop.f32.mrb[10].mxu1 }
 0x349   : > { %2000 = vst.msk [vmem:[%s3966_s8 + $0xd8] sm:$0xff] %vm1972_vm13, %v2491_v8  ;;  %v1943_v11 = vpop.f32.mrb[11].mxu1  ;;  %v2101_v9 = vmul.f32 %v2491_v8, %v2491_v8  ;;  %v2058_v43 = vsel %vm1972_vm13, %v2491_v8, 0.0 }
 0x34a   : > { %1999 = vst.msk [vmem:[%s3966_s8 + $0xd0] sm:$0xff] %vm1972_vm13, %v1943_v11  ;;  %v2056_v19 = vsel %vm1972_vm13, %v1943_v11, 0.0  ;;  %v2100_v47 = vmul.f32 %v1943_v11, %v1943_v11 }
 0x34b   : > { %v2057_v32 = vadd.f32 %v2056_v19, %v2055_v23  ;;  %v2159_v17 = vsel %vm1972_vm13, %v2101_v9, 0.0 }
 0x34c   : > { %v2157_v7 = vsel %vm1972_vm13, %v2100_v47, 0.0 }
 0x34d   : > { %v2158_v59 = vadd.f32 %v2157_v7, %v2156_v39  ;;  %v2059_v38 = vadd.f32 %v2058_v43, %v2057_v32 }
 0x34f   : > { %v2160_v44 = vadd.f32 %v2159_v17, %v2158_v59 }
 0x360   : > { %v2494_v31 = vpop.f32.mrb[12].mxu1 }
 0x361   : > { %2002 = vst.msk [vmem:[%s3966_s8 + $0xe8] sm:$0xff] %vm1972_vm13, %v2494_v31  ;;  %v1953_v13 = vpop.f32.mrb[13].mxu1  ;;  %v2103_v36 = vmul.f32 %v2494_v31, %v2494_v31  ;;  %v2062_v41 = vsel %vm1972_vm13, %v2494_v31, 0.0 }
 0x362   : > { %2001 = vst.msk [vmem:[%s3966_s8 + $0xe0] sm:$0xff] %vm1972_vm13, %v1953_v13  ;;  %v2060_v22 = vsel %vm1972_vm13, %v1953_v13, 0.0  ;;  %v2102_v33 = vmul.f32 %v1953_v13, %v1953_v13 }
 0x363   : > { %v2061_v56 = vadd.f32 %v2060_v22, %v2059_v38  ;;  %v2163_v60 = vsel %vm1972_vm13, %v2103_v36, 0.0 }
 0x364   : > { %v2161_v28 = vsel %vm1972_vm13, %v2102_v33, 0.0 }
 0x365   : > { %v2162_v61 = vadd.f32 %v2161_v28, %v2160_v44  ;;  %v2063_v21 = vadd.f32 %v2062_v41, %v2061_v56 }
 0x367   : > { %v2164_v25 = vadd.f32 %v2163_v60, %v2162_v61 }
 0x36d   : > { %v2497_v3 = vpop.f32.mrb[14].mxu1 }
 0x36e   : > { %2004 = vst.msk [vmem:[%s3966_s8 + $0xf8] sm:$0xff] %vm1972_vm13, %v2497_v3  ;;  %v1963_v58 = vpop.f32.mrb[15].mxu1  ;;  %v2105_v15 = vmul.f32 %v2497_v3, %v2497_v3  ;;  %v2066_v24 = vsel %vm1972_vm13, %v2497_v3, 0.0 }
 0x36f   : > { %2003 = vst.msk [vmem:[%s3966_s8 + $0xf0] sm:$0xff] %vm1972_vm13, %v1963_v58  ;;  %v2064_v26 = vsel %vm1972_vm13, %v1963_v58, 0.0  ;;  %v2104_v40 = vmul.f32 %v1963_v58, %v1963_v58 }
 0x370   : > { %v2065_v18 = vadd.f32 %v2064_v26, %v2063_v21  ;;  %v2167_v20 = vsel %vm1972_vm13, %v2105_v15, 0.0 }
 0x371   : > { %v2165_v46 = vsel %vm1972_vm13, %v2104_v40, 0.0 }
 0x372   : > { %v2067_v49 = vadd.f32 %v2066_v24, %v2065_v18  ;;  %v2166_v53 = vadd.f32 %v2165_v46, %v2164_v25 }
 0x374   : > { %v2068_v57 = vrot.slane %v2067_v49, 4  ;;  %v2168_v54 = vadd.f32 %v2167_v20, %v2166_v53 }
 0x376   : > { %v2069_v16 = vadd.f32 %v2068_v57, %v2067_v49  ;;  %v2169_v50 = vrot.slane %v2168_v54, 4 }
 0x378   : > { %v2070_v14 = vrot.slane %v2069_v16, 2  ;;  %v2170_v0 = vadd.f32 %v2169_v50, %v2168_v54 }
 0x37a   : > { %v2071_v63 = vadd.f32 %v2070_v14, %v2069_v16  ;;  %v2171_v48 = vrot.slane %v2170_v0, 2 }
 0x37c   : > { %v2072_v52 = vrot.slane %v2071_v63, 1  ;;  %v2172_v35 = vadd.f32 %v2171_v48, %v2170_v0 }
 0x37e   : > { %v2173_v30 = vrot.slane %v2172_v35, 1  ;;  %v2073_v10 = vadd.f32 %v2072_v52, %v2071_v63 }
 0x380   : > { %v2174_v62 = vadd.f32 %v2173_v30, %v2172_v35 }
 0x382   : > { %v2176_v4 = vsel %vm2175_vm14, %v2073_v10, %v2174_v62 }
 0x383   : > { %v2178_v1 = vsel %vm2177_vm15, %v2176_v4, 0.0 }
 0x384   : > { %2179 = vst.msk [vmem:[%s228_s18] sm:$0xff] %vm1972_vm13, %v2178_v1 }
 0x385   : > { %2589 = shalt.err (!%p2586_p5)
}
 0x386   : > { %s2590_s9 = scalar_lea.hbm %s4184_s27, 128  ;;  %s2594_s7 = scalar_lea.hbm %s4235_s3, 256 }
 0x387   : > { %p2591_p6 = scmp.ne.s32.totalorder %s4184_s27, %s2590_s9  ;;  %p2595_p10 = scmp.lt.u32.totalorder %s4184_s27, %s4235_s3 }
 0x388   : > { %p2596_p11 = scmp.lt.u32.totalorder %s2594_s7, %s2590_s9  ;;  %p2598_p13 = scmp.lt.u32.totalorder %s2590_s9, %s4184_s27 }
 0x389   : > { %p2592_p7 = pnand %p2591_p6, %p2725_p4 }
 0x38a   : > { %p2597_p12 = por %p2596_p11, %p2595_p10 }
 0x38b   : > { %p2593_p9 = pneg %p2592_p7 }
 0x38c   : > { %p2599_p0 = por %p2598_p13, %p2597_p12 }
 0x38e   : > { %p2600_p1 = pnand %p2599_p0, %p2593_p9 }
 0x390   : > { %2603 = shalt.err (!%p2600_p1)
}
 0x391   : > { %2513 = dma.vmem_to_hbm [thread:$0]  (%p2725_p4), %s4186_s19, 128, %s4184_s27, %s2193_s15  }
 0x392 PF: > { %p2519_p2 = scmp.ge.s32.totalorder %s2654_s17, 2  ;;  %s2238_s10 = sand.u32 1, %s2634_s12  }
 0x393   : > { %s2239_s11 = scalar_lea.sflag [#allocation4], %s2238_s10 }
 0x394   : > { %p2516_p3 = pnand %p2519_p2, %p2732_p8 }
 0x396   : > { %2629 = dma.done.wait (!%p2516_p3), %s2239_s11, 128  }
 0x397   : > { %2631 = vsyncadd (!%p2516_p3), %s2239_s11, 4294967168  ;;  %s17_s17 = sadd.s32 1, %s2654_s17   ;;  %s4370_s12 = smov %s2638_s13 }
 0x398   : > { %p14_p5 = scmp.ge.s32.totalorder %s17_s17, 4   ;;  %s4371_s13 = smov %s2642_s14 }
 0x399   : > { %s4372_s14 = smov %s2738_s25  ;;  %s4373_s15 = smov %s2650_s16 }
 0x39a   : > { %s4374_s16 = smov %s4376_s20  ;;  %16 = sbr.rel (!%p14_p5) target bundleno = 4 (0x4), region = 78 }
 0x3a1   :  { %2244 = vsyncpa [#allocation4], 1 }
 0x3a2   :  { %2246 = vsyncpa [#allocation4 + $0x1], 1 }

</bundles_post_ra>
